<compile_context>
chip_gen: v6e
topology: v6e:2x2x1
jax: 0.10.0
libtpu: 0.0.40
codegen_flags: <defaults>
</compile_context>

<pallas_src>
import functools

import jax
import jax.numpy as jnp
from jax import lax
from jax.experimental import pallas as pl
from jax.experimental.pallas import tpu as pltpu


def _attn_kernel(x_ref, wq_ref, wk_ref, wv_ref, masks_ref, mproj_ref,
                 o_ref, k_scr, v_scr,
                 *, TQ, GH, LH, HD, L, mm_dtype):
    """One (batch, query-tile) grid step of masked multi-head attention."""
    qi = pl.program_id(1)

    # --- K/V projections: once per batch element. The query-tile axis is
    # "arbitrary" (sequential per core), so qi == 0 always runs first for each
    # batch; results stay resident in bf16 VMEM scratch for all query tiles.
    @pl.when(qi == 0)
    def _():
        x_all = x_ref[0].astype(mm_dtype)                                  # (N, C)
        k_scr[...] = jnp.dot(x_all, wk_ref[...].astype(mm_dtype),
                             preferred_element_type=jnp.float32).astype(mm_dtype)
        v_scr[...] = jnp.dot(x_all, wv_ref[...].astype(mm_dtype),
                             preferred_element_type=jnp.float32).astype(mm_dtype)

    # --- Q projection for this query tile (dynamic row slice of resident x).
    row0 = pl.multiple_of(qi * TQ, TQ)
    x_q = x_ref[0, pl.ds(row0, TQ), :].astype(mm_dtype)                    # (TQ, C)
    q = jnp.dot(x_q, wq_ref[...].astype(mm_dtype),
                preferred_element_type=jnp.float32).astype(mm_dtype)       # (TQ, GH*HD)

    k_all = k_scr[...]                                                     # (N, GH*HD) bf16
    v_all = v_scr[...]                                                     # (N, C)     bf16

    # --- Per-global-head raw scores q_g @ k_g^T (bf16 operands, f32 MXU acc).
    contract_qk = (((1,), (1,)), ((), ()))
    scores = [
        lax.dot_general(q[:, g * HD:(g + 1) * HD],
                        k_all[:, g * HD:(g + 1) * HD],
                        contract_qk, preferred_element_type=jnp.float32)
        for g in range(GH)
    ]                                                                      # GH x (TQ, N) f32

    # --- Lane-dense mask tiles, loaded once and reused by every local head.
    mask_tiles = [masks_ref[l] for l in range(L)]                          # L x (TQ, N) f32

    # --- Per local head: VPU mixing with scalar coefficients from SMEM
    # (no (TQ, N, GH*LH) tensor), f32 stabilized softmax with normalization
    # deferred past the PV matmul, per-head write into the (TQ, C) output block.
    for h in range(LH):
        a = None
        for l in range(L):
            t = scores[0] * mproj_ref[l, h]                    # g = 0
            for g in range(1, GH):
                t = t + scores[g] * mproj_ref[l, g * LH + h]
            c_lh = mask_tiles[l] * t
            a = c_lh if a is None else a + c_lh                            # (TQ, N) f32

        a = a - jnp.max(a, axis=-1, keepdims=True)
        p = jnp.exp(a)                                                     # unnormalized
        inv = pl.reciprocal(jnp.sum(p, axis=-1, keepdims=True), approx=True)
        out_h = jnp.dot(p.astype(mm_dtype), v_all[:, h * HD:(h + 1) * HD],
                        preferred_element_type=jnp.float32)                # (TQ, HD)
        o_ref[0, :, pl.ds(h * HD, HD)] = (out_h * inv).astype(o_ref.dtype)


def _pick_query_tile(n):
    for t in (256, 128):
        if n % t == 0:
            return t
    return n


def attn_pallas(x, wq, wk, wv, masks, mask_proj, *,
                local_heads, global_heads, mm_dtype=jnp.bfloat16):
    B, N, C = x.shape
    assert C % local_heads == 0
    HD = C // local_heads
    GD = HD * global_heads
    L = masks.shape[-1]
    TQ = _pick_query_tile(N)
    n_q = N // TQ

    # Lane-dense mask layout (key axis on lanes); one-time XLA-side transpose.
    masks_t = jnp.transpose(masks, (2, 0, 1))                              # (L, N, N)

    kernel = functools.partial(_attn_kernel, TQ=TQ, GH=global_heads,
                               LH=local_heads, HD=HD, L=L, mm_dtype=mm_dtype)

    flops = B * (2 * N * C * (2 * GD + C)                                  # projections
                 + 2 * (global_heads + local_heads) * N * N * HD           # QK^T + PV
                 + 2 * L * local_heads * (global_heads + 1) * N * N)       # VPU mixing
    bytes_accessed = (x.size * x.dtype.itemsize
                      + wq.size * wq.dtype.itemsize
                      + wk.size * wk.dtype.itemsize
                      + wv.size * wv.dtype.itemsize
                      + masks.size * masks.dtype.itemsize
                      + mask_proj.size * mask_proj.dtype.itemsize
                      + B * N * C * x.dtype.itemsize)
    cost = pl.CostEstimate(flops=flops,
                           transcendentals=B * local_heads * N * N,
                           bytes_accessed=bytes_accessed)

    return pl.pallas_call(
        kernel,
        out_shape=jax.ShapeDtypeStruct((B, N, C), x.dtype),
        grid=(B, n_q),
        in_specs=[
            pl.BlockSpec((1, N, C), lambda b, qi: (b, 0, 0)),      # x, resident per batch
            pl.BlockSpec((C, GD), lambda b, qi: (0, 0)),           # W_q
            pl.BlockSpec((C, GD), lambda b, qi: (0, 0)),           # W_k
            pl.BlockSpec((C, C), lambda b, qi: (0, 0)),            # W_v
            pl.BlockSpec((L, TQ, N), lambda b, qi: (0, qi, 0)),    # masks (L, N, N)
            pl.BlockSpec(memory_space=pltpu.MemorySpace.SMEM),     # mask_proj scalars
        ],
        out_specs=pl.BlockSpec((1, TQ, C), lambda b, qi: (b, qi, 0)),
        scratch_shapes=[
            pltpu.VMEM((N, GD), mm_dtype),   # K, resident per batch element
            pltpu.VMEM((N, C), mm_dtype),    # V, resident per batch element
        ],
        compiler_params=pltpu.CompilerParams(
            # NOTE: if B == 1 on v7x, swap semantics so the query axis is the
            # parallel one (needs >= 2 parallel steps to use both TensorCores).
            dimension_semantics=("parallel", "arbitrary"),
            vmem_limit_bytes=48 * 1024 * 1024),
        cost_estimate=cost,
    )(x, wq, wk, wv, masks_t, mask_proj)


def attn_reference(x, wq, wk, wv, masks, mask_proj, *, local_heads, global_heads,
                   mm_dtype=jnp.float32):
    """Pure-JAX transcription of the PyTorch forward.

    `mm_dtype` mirrors the kernel's matmul operand precision (bf16 operands,
    f32 accumulation) and the deferred softmax normalization (mathematically
    identical to softmax @ V) so the comparison isolates kernel bugs from
    expected low-precision rounding.
    """
    B, N, C = x.shape
    GH, LH = global_heads, local_heads
    HD = C // LH
    L = masks.shape[-1]

    xm = x.astype(mm_dtype)
    q = jnp.einsum('bnc,cd->bnd', xm, wq.astype(mm_dtype),
                   preferred_element_type=jnp.float32)
    k = jnp.einsum('bnc,cd->bnd', xm, wk.astype(mm_dtype),
                   preferred_element_type=jnp.float32)
    v = jnp.einsum('bnc,cd->bnd', xm, wv.astype(mm_dtype),
                   preferred_element_type=jnp.float32)
    q = q.reshape(B, N, GH, HD).transpose(0, 2, 1, 3).astype(mm_dtype)
    k = k.reshape(B, N, GH, HD).transpose(0, 2, 1, 3).astype(mm_dtype)
    v = v.reshape(B, N, LH, HD).transpose(0, 2, 1, 3).astype(mm_dtype)

    attn = jnp.einsum('bgnd,bgmd->bgnm', q, k,
                      preferred_element_type=jnp.float32)                  # (B, GH, N, N)
    mw = (masks.reshape(N * N, L) @ mask_proj).reshape(1, N, N, GH, LH)
    attn = attn.transpose(0, 2, 3, 1)[..., None] * mw                      # (B, N, N, GH, LH)
    attn = attn.sum(axis=-2).transpose(0, 3, 1, 2)                         # (B, LH, N, N)
    attn = attn - attn.max(axis=-1, keepdims=True)
    p = jnp.exp(attn)
    denom = p.sum(axis=-1, keepdims=True)
    out = jnp.einsum('bhnm,bhmd->bhnd', p.astype(mm_dtype), v,
                     preferred_element_type=jnp.float32) / denom
    return out.transpose(0, 2, 1, 3).reshape(B, N, C).astype(x.dtype)


if __name__ == "__main__":
    # Small shapes consistent with the module defaults.
    B, N, dim = 2, 8, 128
    local_heads, global_heads, mask_levels = 8, 4, 3
    HD = dim // local_heads          # 16
    GD = HD * global_heads           # 64

    key = jax.random.PRNGKey(0)
    kx, kq, kk, kv, km = jax.random.split(key, 5)
    x = jax.random.normal(kx, (B, N, dim), jnp.float32)
    # Deterministic synthetic parameters (Linear weights, stored (in, out)).
    wq = jax.random.normal(kq, (dim, GD), jnp.float32) * 0.05
    wk = jax.random.normal(kk, (dim, GD), jnp.float32) * 0.05
    wv = jax.random.normal(kv, (dim, dim), jnp.float32) * 0.05
    # masks is an external input in the module (shape (N, N, mask_levels)).
    masks = jax.random.normal(km, (N, N, mask_levels), jnp.float32)
    # mask_proj initialized to ones, exactly as in the module's __init__.
    mask_proj = jnp.ones((mask_levels, global_heads * local_heads), jnp.float32)

    out = attn_pallas(x, wq, wk, wv, masks, mask_proj,
                      local_heads=local_heads, global_heads=global_heads)
    out = jax.block_until_ready(out)

    ref = attn_reference(x, wq, wk, wv, masks, mask_proj,
                         local_heads=local_heads, global_heads=global_heads,
                         mm_dtype=jnp.bfloat16)   # mirror the kernel's MXU precision
    assert out.shape == (B, N, dim)
    assert jnp.allclose(out, ref, atol=1e-2, rtol=1e-2), "mismatch vs reference"
    print("KERNEL_OK")
</pallas_src>

<mosaic_0001>
module attributes {stable_mosaic.version = 11 : i64} {
  func.func @_attn_kernel(%arg0: i32, %arg1: i32, %arg2: memref<1x8x128xf32, #tpu.memory_space<vmem>>, %arg3: memref<128x64xf32, #tpu.memory_space<vmem>>, %arg4: memref<128x64xf32, #tpu.memory_space<vmem>>, %arg5: memref<128x128xf32, #tpu.memory_space<vmem>>, %arg6: memref<3x8x8xf32, #tpu.memory_space<vmem>>, %arg7: memref<3x32xf32, #tpu.memory_space<smem>>, %arg8: memref<1x8x128xf32, #tpu.memory_space<vmem>>, %arg9: memref<8x64xbf16, #tpu.memory_space<vmem>>, %arg10: memref<8x128xbf16, #tpu.memory_space<vmem>>) attributes {dimension_semantics = [#tpu.dimension_semantics<parallel>, #tpu.dimension_semantics<arbitrary>], iteration_bounds = array<i64: 2, 1>, scalar_prefetch = 0 : i64, scratch_operands = 2 : i64, tpu.core_type = #tpu.core_type<tc>, window_params = [{transform_indices = @transform_0, window_bounds = array<i64: 1, 8, 128>}, {pipeline_mode = #tpu.pipeline_mode<synchronous>, transform_indices = @transform_1, window_bounds = array<i64: 128, 64>}, {pipeline_mode = #tpu.pipeline_mode<synchronous>, transform_indices = @transform_2, window_bounds = array<i64: 128, 64>}, {pipeline_mode = #tpu.pipeline_mode<synchronous>, transform_indices = @transform_3, window_bounds = array<i64: 128, 128>}, {transform_indices = @transform_4, window_bounds = array<i64: 3, 8, 8>}, {transform_indices = @transform_5, window_bounds = array<i64: 3, 32>}, {transform_indices = @transform_6, window_bounds = array<i64: 1, 8, 128>}]} {
    %c0_i32 = arith.constant 0 : i32
    %0 = arith.cmpi eq, %arg1, %c0_i32 : i32
    %1 = arith.extui %0 : i1 to i32
    %c0_i32_0 = arith.constant 0 : i32
    %2 = arith.cmpi ne, %1, %c0_i32_0 : i32
    scf.if %2 {
      %c0_224 = arith.constant 0 : index
      %c0_225 = arith.constant 0 : index
      %c0_226 = arith.constant 0 : index
      %561 = vector.load %arg2[%c0_224, %c0_225, %c0_226] : memref<1x8x128xf32, #tpu.memory_space<vmem>>, vector<1x8x128xf32>
      %562 = vector.shape_cast %561 : vector<1x8x128xf32> to vector<8x128xf32>
      %563 = arith.truncf %562 : vector<8x128xf32> to vector<8x128xbf16>
      %c0_227 = arith.constant 0 : index
      %c0_228 = arith.constant 0 : index
      %564 = vector.load %arg4[%c0_227, %c0_228] : memref<128x64xf32, #tpu.memory_space<vmem>>, vector<128x64xf32>
      %565 = arith.truncf %564 : vector<128x64xf32> to vector<128x64xbf16>
      %cst_229 = arith.constant dense<0.000000e+00> : vector<8x64xf32>
      %566 = tpu.matmul %563, %565, %cst_229 {dimension_numbers = #tpu.dot_dimension_numbers<[1], [0], [0], [1], [0, 0, 1, 1], [], []>} : vector<8x128xbf16>, vector<128x64xbf16>, vector<8x64xf32> -> vector<8x64xf32>
      %567 = arith.truncf %566 : vector<8x64xf32> to vector<8x64xbf16>
      %c0_230 = arith.constant 0 : index
      %c0_231 = arith.constant 0 : index
      %568 = vector.load %arg9[%c0_230, %c0_231] : memref<8x64xbf16, #tpu.memory_space<vmem>>, vector<8x64xbf16>
      tpu.vector_store %arg9[%c0_230, %c0_231], %567 {strides = array<i32>} : memref<8x64xbf16, #tpu.memory_space<vmem>>, vector<8x64xbf16>,
      %c0_232 = arith.constant 0 : index
      %c0_233 = arith.constant 0 : index
      %569 = vector.load %arg5[%c0_232, %c0_233] : memref<128x128xf32, #tpu.memory_space<vmem>>, vector<128x128xf32>
      %570 = arith.truncf %569 : vector<128x128xf32> to vector<128x128xbf16>
      %cst_234 = arith.constant dense<0.000000e+00> : vector<8x128xf32>
      %571 = tpu.matmul %563, %570, %cst_234 {dimension_numbers = #tpu.dot_dimension_numbers<[1], [0], [0], [1], [0, 0, 1, 1], [], []>} : vector<8x128xbf16>, vector<128x128xbf16>, vector<8x128xf32> -> vector<8x128xf32>
      %572 = arith.truncf %571 : vector<8x128xf32> to vector<8x128xbf16>
      %c0_235 = arith.constant 0 : index
      %c0_236 = arith.constant 0 : index
      %573 = vector.load %arg10[%c0_235, %c0_236] : memref<8x128xbf16, #tpu.memory_space<vmem>>, vector<8x128xbf16>
      tpu.vector_store %arg10[%c0_235, %c0_236], %572 {strides = array<i32>} : memref<8x128xbf16, #tpu.memory_space<vmem>>, vector<8x128xbf16>,
    } else {
    }
    %c8_i32 = arith.constant 8 : i32
    %3 = arith.muli %arg1, %c8_i32 : i32
    %4 = tpu.assume_multiple %3, 8 : i32
    %c0 = arith.constant 0 : index
    %5 = arith.index_cast %4 : i32 to index
    %c0_1 = arith.constant 0 : index
    %6 = vector.load %arg2[%c0, %5, %c0_1] : memref<1x8x128xf32, #tpu.memory_space<vmem>>, vector<1x8x128xf32>
    %7 = vector.shape_cast %6 : vector<1x8x128xf32> to vector<8x128xf32>
    %8 = arith.truncf %7 : vector<8x128xf32> to vector<8x128xbf16>
    %c0_2 = arith.constant 0 : index
    %c0_3 = arith.constant 0 : index
    %9 = vector.load %arg3[%c0_2, %c0_3] : memref<128x64xf32, #tpu.memory_space<vmem>>, vector<128x64xf32>
    %10 = arith.truncf %9 : vector<128x64xf32> to vector<128x64xbf16>
    %cst = arith.constant dense<0.000000e+00> : vector<8x64xf32>
    %11 = tpu.matmul %8, %10, %cst {dimension_numbers = #tpu.dot_dimension_numbers<[1], [0], [0], [1], [0, 0, 1, 1], [], []>} : vector<8x128xbf16>, vector<128x64xbf16>, vector<8x64xf32> -> vector<8x64xf32>
    %12 = arith.truncf %11 : vector<8x64xf32> to vector<8x64xbf16>
    %c0_4 = arith.constant 0 : index
    %c0_5 = arith.constant 0 : index
    %13 = vector.load %arg9[%c0_4, %c0_5] : memref<8x64xbf16, #tpu.memory_space<vmem>>, vector<8x64xbf16>
    %c0_6 = arith.constant 0 : index
    %c0_7 = arith.constant 0 : index
    %14 = vector.load %arg10[%c0_6, %c0_7] : memref<8x128xbf16, #tpu.memory_space<vmem>>, vector<8x128xbf16>
    %15 = vector.extract_strided_slice %12 {offsets = [0, 0], sizes = [8, 16], strides = [1, 1]} : vector<8x64xbf16> to vector<8x16xbf16>
    %16 = vector.extract_strided_slice %13 {offsets = [0, 0], sizes = [8, 16], strides = [1, 1]} : vector<8x64xbf16> to vector<8x16xbf16>
    %cst_8 = arith.constant dense<0.000000e+00> : vector<8x8xf32>
    %17 = tpu.matmul %15, %16, %cst_8 {dimension_numbers = #tpu.dot_dimension_numbers<[1], [1], [0], [0], [0, 0, 1, 0], [], []>} : vector<8x16xbf16>, vector<8x16xbf16>, vector<8x8xf32> -> vector<8x8xf32>
    %18 = vector.extract_strided_slice %12 {offsets = [0, 16], sizes = [8, 16], strides = [1, 1]} : vector<8x64xbf16> to vector<8x16xbf16>
    %19 = vector.extract_strided_slice %13 {offsets = [0, 16], sizes = [8, 16], strides = [1, 1]} : vector<8x64xbf16> to vector<8x16xbf16>
    %cst_9 = arith.constant dense<0.000000e+00> : vector<8x8xf32>
    %20 = tpu.matmul %18, %19, %cst_9 {dimension_numbers = #tpu.dot_dimension_numbers<[1], [1], [0], [0], [0, 0, 1, 0], [], []>} : vector<8x16xbf16>, vector<8x16xbf16>, vector<8x8xf32> -> vector<8x8xf32>
    %21 = vector.extract_strided_slice %12 {offsets = [0, 32], sizes = [8, 16], strides = [1, 1]} : vector<8x64xbf16> to vector<8x16xbf16>
    %22 = vector.extract_strided_slice %13 {offsets = [0, 32], sizes = [8, 16], strides = [1, 1]} : vector<8x64xbf16> to vector<8x16xbf16>
    %cst_10 = arith.constant dense<0.000000e+00> : vector<8x8xf32>
    %23 = tpu.matmul %21, %22, %cst_10 {dimension_numbers = #tpu.dot_dimension_numbers<[1], [1], [0], [0], [0, 0, 1, 0], [], []>} : vector<8x16xbf16>, vector<8x16xbf16>, vector<8x8xf32> -> vector<8x8xf32>
    %24 = vector.extract_strided_slice %12 {offsets = [0, 48], sizes = [8, 16], strides = [1, 1]} : vector<8x64xbf16> to vector<8x16xbf16>
    %25 = vector.extract_strided_slice %13 {offsets = [0, 48], sizes = [8, 16], strides = [1, 1]} : vector<8x64xbf16> to vector<8x16xbf16>
    %cst_11 = arith.constant dense<0.000000e+00> : vector<8x8xf32>
    %26 = tpu.matmul %24, %25, %cst_11 {dimension_numbers = #tpu.dot_dimension_numbers<[1], [1], [0], [0], [0, 0, 1, 0], [], []>} : vector<8x16xbf16>, vector<8x16xbf16>, vector<8x8xf32> -> vector<8x8xf32>
    %c0_12 = arith.constant 0 : index
    %c0_13 = arith.constant 0 : index
    %c0_14 = arith.constant 0 : index
    %27 = vector.load %arg6[%c0_12, %c0_13, %c0_14] : memref<3x8x8xf32, #tpu.memory_space<vmem>>, vector<1x8x8xf32>
    %28 = vector.shape_cast %27 : vector<1x8x8xf32> to vector<8x8xf32>
    %c1 = arith.constant 1 : index
    %c0_15 = arith.constant 0 : index
    %c0_16 = arith.constant 0 : index
    %29 = vector.load %arg6[%c1, %c0_15, %c0_16] : memref<3x8x8xf32, #tpu.memory_space<vmem>>, vector<1x8x8xf32>
    %30 = vector.shape_cast %29 : vector<1x8x8xf32> to vector<8x8xf32>
    %c2 = arith.constant 2 : index
    %c0_17 = arith.constant 0 : index
    %c0_18 = arith.constant 0 : index
    %31 = vector.load %arg6[%c2, %c0_17, %c0_18] : memref<3x8x8xf32, #tpu.memory_space<vmem>>, vector<1x8x8xf32>
    %32 = vector.shape_cast %31 : vector<1x8x8xf32> to vector<8x8xf32>
    %c0_19 = arith.constant 0 : index
    %c0_20 = arith.constant 0 : index
    %33 = memref.load %arg7[%c0_19, %c0_20] : memref<3x32xf32, #tpu.memory_space<smem>>
    %34 = vector.broadcast %33 : f32 to vector<8x8xf32>
    %35 = arith.mulf %17, %34 : vector<8x8xf32>
    %c0_21 = arith.constant 0 : index
    %c8 = arith.constant 8 : index
    %36 = memref.load %arg7[%c0_21, %c8] : memref<3x32xf32, #tpu.memory_space<smem>>
    %37 = vector.broadcast %36 : f32 to vector<8x8xf32>
    %38 = arith.mulf %20, %37 : vector<8x8xf32>
    %39 = arith.addf %35, %38 : vector<8x8xf32>
    %c0_22 = arith.constant 0 : index
    %c16 = arith.constant 16 : index
    %40 = memref.load %arg7[%c0_22, %c16] : memref<3x32xf32, #tpu.memory_space<smem>>
    %41 = vector.broadcast %40 : f32 to vector<8x8xf32>
    %42 = arith.mulf %23, %41 : vector<8x8xf32>
    %43 = arith.addf %39, %42 : vector<8x8xf32>
    %c0_23 = arith.constant 0 : index
    %c24 = arith.constant 24 : index
    %44 = memref.load %arg7[%c0_23, %c24] : memref<3x32xf32, #tpu.memory_space<smem>>
    %45 = vector.broadcast %44 : f32 to vector<8x8xf32>
    %46 = arith.mulf %26, %45 : vector<8x8xf32>
    %47 = arith.addf %43, %46 : vector<8x8xf32>
    %48 = arith.mulf %28, %47 : vector<8x8xf32>
    %c1_24 = arith.constant 1 : index
    %c0_25 = arith.constant 0 : index
    %49 = memref.load %arg7[%c1_24, %c0_25] : memref<3x32xf32, #tpu.memory_space<smem>>
    %50 = vector.broadcast %49 : f32 to vector<8x8xf32>
    %51 = arith.mulf %17, %50 : vector<8x8xf32>
    %c1_26 = arith.constant 1 : index
    %c8_27 = arith.constant 8 : index
    %52 = memref.load %arg7[%c1_26, %c8_27] : memref<3x32xf32, #tpu.memory_space<smem>>
    %53 = vector.broadcast %52 : f32 to vector<8x8xf32>
    %54 = arith.mulf %20, %53 : vector<8x8xf32>
    %55 = arith.addf %51, %54 : vector<8x8xf32>
    %c1_28 = arith.constant 1 : index
    %c16_29 = arith.constant 16 : index
    %56 = memref.load %arg7[%c1_28, %c16_29] : memref<3x32xf32, #tpu.memory_space<smem>>
    %57 = vector.broadcast %56 : f32 to vector<8x8xf32>
    %58 = arith.mulf %23, %57 : vector<8x8xf32>
    %59 = arith.addf %55, %58 : vector<8x8xf32>
    %c1_30 = arith.constant 1 : index
    %c24_31 = arith.constant 24 : index
    %60 = memref.load %arg7[%c1_30, %c24_31] : memref<3x32xf32, #tpu.memory_space<smem>>
    %61 = vector.broadcast %60 : f32 to vector<8x8xf32>
    %62 = arith.mulf %26, %61 : vector<8x8xf32>
    %63 = arith.addf %59, %62 : vector<8x8xf32>
    %64 = arith.mulf %30, %63 : vector<8x8xf32>
    %65 = arith.addf %48, %64 : vector<8x8xf32>
    %c2_32 = arith.constant 2 : index
    %c0_33 = arith.constant 0 : index
    %66 = memref.load %arg7[%c2_32, %c0_33] : memref<3x32xf32, #tpu.memory_space<smem>>
    %67 = vector.broadcast %66 : f32 to vector<8x8xf32>
    %68 = arith.mulf %17, %67 : vector<8x8xf32>
    %c2_34 = arith.constant 2 : index
    %c8_35 = arith.constant 8 : index
    %69 = memref.load %arg7[%c2_34, %c8_35] : memref<3x32xf32, #tpu.memory_space<smem>>
    %70 = vector.broadcast %69 : f32 to vector<8x8xf32>
    %71 = arith.mulf %20, %70 : vector<8x8xf32>
    %72 = arith.addf %68, %71 : vector<8x8xf32>
    %c2_36 = arith.constant 2 : index
    %c16_37 = arith.constant 16 : index
    %73 = memref.load %arg7[%c2_36, %c16_37] : memref<3x32xf32, #tpu.memory_space<smem>>
    %74 = vector.broadcast %73 : f32 to vector<8x8xf32>
    %75 = arith.mulf %23, %74 : vector<8x8xf32>
    %76 = arith.addf %72, %75 : vector<8x8xf32>
    %c2_38 = arith.constant 2 : index
    %c24_39 = arith.constant 24 : index
    %77 = memref.load %arg7[%c2_38, %c24_39] : memref<3x32xf32, #tpu.memory_space<smem>>
    %78 = vector.broadcast %77 : f32 to vector<8x8xf32>
    %79 = arith.mulf %26, %78 : vector<8x8xf32>
    %80 = arith.addf %76, %79 : vector<8x8xf32>
    %81 = arith.mulf %32, %80 : vector<8x8xf32>
    %82 = arith.addf %65, %81 : vector<8x8xf32>
    %cst_40 = arith.constant dense<0xFF800000> : vector<8xf32>
    %83 = vector.multi_reduction <maximumf>, %82, %cst_40 [1] : vector<8x8xf32> to vector<8xf32>
    %84 = vector.shape_cast %83 : vector<8xf32> to vector<8x1xf32>
    %85 = vector.broadcast %84 : vector<8x1xf32> to vector<8x8xf32>
    %86 = arith.subf %82, %85 : vector<8x8xf32>
    %87 = math.exp %86 : vector<8x8xf32>
    %cst_41 = arith.constant dense<0.000000e+00> : vector<8xf32>
    %88 = vector.multi_reduction <add>, %87, %cst_41 [1] : vector<8x8xf32> to vector<8xf32>
    %89 = vector.shape_cast %88 : vector<8xf32> to vector<8x1xf32>
    %90 = tpu.reciprocal %89 {approx = true} : vector<8x1xf32> -> vector<8x1xf32>
    %91 = arith.truncf %87 : vector<8x8xf32> to vector<8x8xbf16>
    %92 = vector.extract_strided_slice %14 {offsets = [0, 0], sizes = [8, 16], strides = [1, 1]} : vector<8x128xbf16> to vector<8x16xbf16>
    %cst_42 = arith.constant dense<0.000000e+00> : vector<8x16xf32>
    %93 = tpu.matmul %91, %92, %cst_42 {dimension_numbers = #tpu.dot_dimension_numbers<[1], [0], [0], [1], [0, 0, 1, 1], [], []>} : vector<8x8xbf16>, vector<8x16xbf16>, vector<8x16xf32> -> vector<8x16xf32>
    %94 = vector.broadcast %90 : vector<8x1xf32> to vector<8x16xf32>
    %95 = arith.mulf %93, %94 : vector<8x16xf32>
    %c0_43 = arith.constant 0 : index
    %c0_44 = arith.constant 0 : index
    %c0_45 = arith.constant 0 : index
    %96 = vector.load %arg8[%c0_43, %c0_44, %c0_45] : memref<1x8x128xf32, #tpu.memory_space<vmem>>, vector<1x8x16xf32>
    %97 = vector.shape_cast %96 : vector<1x8x16xf32> to vector<8x16xf32>
    %98 = vector.shape_cast %95 : vector<8x16xf32> to vector<1x8x16xf32>
    tpu.vector_store %arg8[%c0_43, %c0_44, %c0_45], %98 {strides = array<i32>} : memref<1x8x128xf32, #tpu.memory_space<vmem>>, vector<1x8x16xf32>,
    %c0_46 = arith.constant 0 : index
    %c1_47 = arith.constant 1 : index
    %99 = memref.load %arg7[%c0_46, %c1_47] : memref<3x32xf32, #tpu.memory_space<smem>>
    %100 = vector.broadcast %99 : f32 to vector<8x8xf32>
    %101 = arith.mulf %17, %100 : vector<8x8xf32>
    %c0_48 = arith.constant 0 : index
    %c9 = arith.constant 9 : index
    %102 = memref.load %arg7[%c0_48, %c9] : memref<3x32xf32, #tpu.memory_space<smem>>
    %103 = vector.broadcast %102 : f32 to vector<8x8xf32>
    %104 = arith.mulf %20, %103 : vector<8x8xf32>
    %105 = arith.addf %101, %104 : vector<8x8xf32>
    %c0_49 = arith.constant 0 : index
    %c17 = arith.constant 17 : index
    %106 = memref.load %arg7[%c0_49, %c17] : memref<3x32xf32, #tpu.memory_space<smem>>
    %107 = vector.broadcast %106 : f32 to vector<8x8xf32>
    %108 = arith.mulf %23, %107 : vector<8x8xf32>
    %109 = arith.addf %105, %108 : vector<8x8xf32>
    %c0_50 = arith.constant 0 : index
    %c25 = arith.constant 25 : index
    %110 = memref.load %arg7[%c0_50, %c25] : memref<3x32xf32, #tpu.memory_space<smem>>
    %111 = vector.broadcast %110 : f32 to vector<8x8xf32>
    %112 = arith.mulf %26, %111 : vector<8x8xf32>
    %113 = arith.addf %109, %112 : vector<8x8xf32>
    %114 = arith.mulf %28, %113 : vector<8x8xf32>
    %c1_51 = arith.constant 1 : index
    %c1_52 = arith.constant 1 : index
    %115 = memref.load %arg7[%c1_51, %c1_52] : memref<3x32xf32, #tpu.memory_space<smem>>
    %116 = vector.broadcast %115 : f32 to vector<8x8xf32>
    %117 = arith.mulf %17, %116 : vector<8x8xf32>
    %c1_53 = arith.constant 1 : index
    %c9_54 = arith.constant 9 : index
    %118 = memref.load %arg7[%c1_53, %c9_54] : memref<3x32xf32, #tpu.memory_space<smem>>
    %119 = vector.broadcast %118 : f32 to vector<8x8xf32>
    %120 = arith.mulf %20, %119 : vector<8x8xf32>
    %121 = arith.addf %117, %120 : vector<8x8xf32>
    %c1_55 = arith.constant 1 : index
    %c17_56 = arith.constant 17 : index
    %122 = memref.load %arg7[%c1_55, %c17_56] : memref<3x32xf32, #tpu.memory_space<smem>>
    %123 = vector.broadcast %122 : f32 to vector<8x8xf32>
    %124 = arith.mulf %23, %123 : vector<8x8xf32>
    %125 = arith.addf %121, %124 : vector<8x8xf32>
    %c1_57 = arith.constant 1 : index
    %c25_58 = arith.constant 25 : index
    %126 = memref.load %arg7[%c1_57, %c25_58] : memref<3x32xf32, #tpu.memory_space<smem>>
    %127 = vector.broadcast %126 : f32 to vector<8x8xf32>
    %128 = arith.mulf %26, %127 : vector<8x8xf32>
    %129 = arith.addf %125, %128 : vector<8x8xf32>
    %130 = arith.mulf %30, %129 : vector<8x8xf32>
    %131 = arith.addf %114, %130 : vector<8x8xf32>
    %c2_59 = arith.constant 2 : index
    %c1_60 = arith.constant 1 : index
    %132 = memref.load %arg7[%c2_59, %c1_60] : memref<3x32xf32, #tpu.memory_space<smem>>
    %133 = vector.broadcast %132 : f32 to vector<8x8xf32>
    %134 = arith.mulf %17, %133 : vector<8x8xf32>
    %c2_61 = arith.constant 2 : index
    %c9_62 = arith.constant 9 : index
    %135 = memref.load %arg7[%c2_61, %c9_62] : memref<3x32xf32, #tpu.memory_space<smem>>
    %136 = vector.broadcast %135 : f32 to vector<8x8xf32>
    %137 = arith.mulf %20, %136 : vector<8x8xf32>
    %138 = arith.addf %134, %137 : vector<8x8xf32>
    %c2_63 = arith.constant 2 : index
    %c17_64 = arith.constant 17 : index
    %139 = memref.load %arg7[%c2_63, %c17_64] : memref<3x32xf32, #tpu.memory_space<smem>>
    %140 = vector.broadcast %139 : f32 to vector<8x8xf32>
    %141 = arith.mulf %23, %140 : vector<8x8xf32>
    %142 = arith.addf %138, %141 : vector<8x8xf32>
    %c2_65 = arith.constant 2 : index
    %c25_66 = arith.constant 25 : index
    %143 = memref.load %arg7[%c2_65, %c25_66] : memref<3x32xf32, #tpu.memory_space<smem>>
    %144 = vector.broadcast %143 : f32 to vector<8x8xf32>
    %145 = arith.mulf %26, %144 : vector<8x8xf32>
    %146 = arith.addf %142, %145 : vector<8x8xf32>
    %147 = arith.mulf %32, %146 : vector<8x8xf32>
    %148 = arith.addf %131, %147 : vector<8x8xf32>
    %cst_67 = arith.constant dense<0xFF800000> : vector<8xf32>
    %149 = vector.multi_reduction <maximumf>, %148, %cst_67 [1] : vector<8x8xf32> to vector<8xf32>
    %150 = vector.shape_cast %149 : vector<8xf32> to vector<8x1xf32>
    %151 = vector.broadcast %150 : vector<8x1xf32> to vector<8x8xf32>
    %152 = arith.subf %148, %151 : vector<8x8xf32>
    %153 = math.exp %152 : vector<8x8xf32>
    %cst_68 = arith.constant dense<0.000000e+00> : vector<8xf32>
    %154 = vector.multi_reduction <add>, %153, %cst_68 [1] : vector<8x8xf32> to vector<8xf32>
    %155 = vector.shape_cast %154 : vector<8xf32> to vector<8x1xf32>
    %156 = tpu.reciprocal %155 {approx = true} : vector<8x1xf32> -> vector<8x1xf32>
    %157 = arith.truncf %153 : vector<8x8xf32> to vector<8x8xbf16>
    %158 = vector.extract_strided_slice %14 {offsets = [0, 16], sizes = [8, 16], strides = [1, 1]} : vector<8x128xbf16> to vector<8x16xbf16>
    %cst_69 = arith.constant dense<0.000000e+00> : vector<8x16xf32>
    %159 = tpu.matmul %157, %158, %cst_69 {dimension_numbers = #tpu.dot_dimension_numbers<[1], [0], [0], [1], [0, 0, 1, 1], [], []>} : vector<8x8xbf16>, vector<8x16xbf16>, vector<8x16xf32> -> vector<8x16xf32>
    %160 = vector.broadcast %156 : vector<8x1xf32> to vector<8x16xf32>
    %161 = arith.mulf %159, %160 : vector<8x16xf32>
    %c0_70 = arith.constant 0 : index
    %c0_71 = arith.constant 0 : index
    %c16_72 = arith.constant 16 : index
    %162 = vector.load %arg8[%c0_70, %c0_71, %c16_72] : memref<1x8x128xf32, #tpu.memory_space<vmem>>, vector<1x8x16xf32>
    %163 = vector.shape_cast %162 : vector<1x8x16xf32> to vector<8x16xf32>
    %164 = vector.shape_cast %161 : vector<8x16xf32> to vector<1x8x16xf32>
    tpu.vector_store %arg8[%c0_70, %c0_71, %c16_72], %164 {strides = array<i32>} : memref<1x8x128xf32, #tpu.memory_space<vmem>>, vector<1x8x16xf32>,
    %c0_73 = arith.constant 0 : index
    %c2_74 = arith.constant 2 : index
    %165 = memref.load %arg7[%c0_73, %c2_74] : memref<3x32xf32, #tpu.memory_space<smem>>
    %166 = vector.broadcast %165 : f32 to vector<8x8xf32>
    %167 = arith.mulf %17, %166 : vector<8x8xf32>
    %c0_75 = arith.constant 0 : index
    %c10 = arith.constant 10 : index
    %168 = memref.load %arg7[%c0_75, %c10] : memref<3x32xf32, #tpu.memory_space<smem>>
    %169 = vector.broadcast %168 : f32 to vector<8x8xf32>
    %170 = arith.mulf %20, %169 : vector<8x8xf32>
    %171 = arith.addf %167, %170 : vector<8x8xf32>
    %c0_76 = arith.constant 0 : index
    %c18 = arith.constant 18 : index
    %172 = memref.load %arg7[%c0_76, %c18] : memref<3x32xf32, #tpu.memory_space<smem>>
    %173 = vector.broadcast %172 : f32 to vector<8x8xf32>
    %174 = arith.mulf %23, %173 : vector<8x8xf32>
    %175 = arith.addf %171, %174 : vector<8x8xf32>
    %c0_77 = arith.constant 0 : index
    %c26 = arith.constant 26 : index
    %176 = memref.load %arg7[%c0_77, %c26] : memref<3x32xf32, #tpu.memory_space<smem>>
    %177 = vector.broadcast %176 : f32 to vector<8x8xf32>
    %178 = arith.mulf %26, %177 : vector<8x8xf32>
    %179 = arith.addf %175, %178 : vector<8x8xf32>
    %180 = arith.mulf %28, %179 : vector<8x8xf32>
    %c1_78 = arith.constant 1 : index
    %c2_79 = arith.constant 2 : index
    %181 = memref.load %arg7[%c1_78, %c2_79] : memref<3x32xf32, #tpu.memory_space<smem>>
    %182 = vector.broadcast %181 : f32 to vector<8x8xf32>
    %183 = arith.mulf %17, %182 : vector<8x8xf32>
    %c1_80 = arith.constant 1 : index
    %c10_81 = arith.constant 10 : index
    %184 = memref.load %arg7[%c1_80, %c10_81] : memref<3x32xf32, #tpu.memory_space<smem>>
    %185 = vector.broadcast %184 : f32 to vector<8x8xf32>
    %186 = arith.mulf %20, %185 : vector<8x8xf32>
    %187 = arith.addf %183, %186 : vector<8x8xf32>
    %c1_82 = arith.constant 1 : index
    %c18_83 = arith.constant 18 : index
    %188 = memref.load %arg7[%c1_82, %c18_83] : memref<3x32xf32, #tpu.memory_space<smem>>
    %189 = vector.broadcast %188 : f32 to vector<8x8xf32>
    %190 = arith.mulf %23, %189 : vector<8x8xf32>
    %191 = arith.addf %187, %190 : vector<8x8xf32>
    %c1_84 = arith.constant 1 : index
    %c26_85 = arith.constant 26 : index
    %192 = memref.load %arg7[%c1_84, %c26_85] : memref<3x32xf32, #tpu.memory_space<smem>>
    %193 = vector.broadcast %192 : f32 to vector<8x8xf32>
    %194 = arith.mulf %26, %193 : vector<8x8xf32>
    %195 = arith.addf %191, %194 : vector<8x8xf32>
    %196 = arith.mulf %30, %195 : vector<8x8xf32>
    %197 = arith.addf %180, %196 : vector<8x8xf32>
    %c2_86 = arith.constant 2 : index
    %c2_87 = arith.constant 2 : index
    %198 = memref.load %arg7[%c2_86, %c2_87] : memref<3x32xf32, #tpu.memory_space<smem>>
    %199 = vector.broadcast %198 : f32 to vector<8x8xf32>
    %200 = arith.mulf %17, %199 : vector<8x8xf32>
    %c2_88 = arith.constant 2 : index
    %c10_89 = arith.constant 10 : index
    %201 = memref.load %arg7[%c2_88, %c10_89] : memref<3x32xf32, #tpu.memory_space<smem>>
    %202 = vector.broadcast %201 : f32 to vector<8x8xf32>
    %203 = arith.mulf %20, %202 : vector<8x8xf32>
    %204 = arith.addf %200, %203 : vector<8x8xf32>
    %c2_90 = arith.constant 2 : index
    %c18_91 = arith.constant 18 : index
    %205 = memref.load %arg7[%c2_90, %c18_91] : memref<3x32xf32, #tpu.memory_space<smem>>
    %206 = vector.broadcast %205 : f32 to vector<8x8xf32>
    %207 = arith.mulf %23, %206 : vector<8x8xf32>
    %208 = arith.addf %204, %207 : vector<8x8xf32>
    %c2_92 = arith.constant 2 : index
    %c26_93 = arith.constant 26 : index
    %209 = memref.load %arg7[%c2_92, %c26_93] : memref<3x32xf32, #tpu.memory_space<smem>>
    %210 = vector.broadcast %209 : f32 to vector<8x8xf32>
    %211 = arith.mulf %26, %210 : vector<8x8xf32>
    %212 = arith.addf %208, %211 : vector<8x8xf32>
    %213 = arith.mulf %32, %212 : vector<8x8xf32>
    %214 = arith.addf %197, %213 : vector<8x8xf32>
    %cst_94 = arith.constant dense<0xFF800000> : vector<8xf32>
    %215 = vector.multi_reduction <maximumf>, %214, %cst_94 [1] : vector<8x8xf32> to vector<8xf32>
    %216 = vector.shape_cast %215 : vector<8xf32> to vector<8x1xf32>
    %217 = vector.broadcast %216 : vector<8x1xf32> to vector<8x8xf32>
    %218 = arith.subf %214, %217 : vector<8x8xf32>
    %219 = math.exp %218 : vector<8x8xf32>
    %cst_95 = arith.constant dense<0.000000e+00> : vector<8xf32>
    %220 = vector.multi_reduction <add>, %219, %cst_95 [1] : vector<8x8xf32> to vector<8xf32>
    %221 = vector.shape_cast %220 : vector<8xf32> to vector<8x1xf32>
    %222 = tpu.reciprocal %221 {approx = true} : vector<8x1xf32> -> vector<8x1xf32>
    %223 = arith.truncf %219 : vector<8x8xf32> to vector<8x8xbf16>
    %224 = vector.extract_strided_slice %14 {offsets = [0, 32], sizes = [8, 16], strides = [1, 1]} : vector<8x128xbf16> to vector<8x16xbf16>
    %cst_96 = arith.constant dense<0.000000e+00> : vector<8x16xf32>
    %225 = tpu.matmul %223, %224, %cst_96 {dimension_numbers = #tpu.dot_dimension_numbers<[1], [0], [0], [1], [0, 0, 1, 1], [], []>} : vector<8x8xbf16>, vector<8x16xbf16>, vector<8x16xf32> -> vector<8x16xf32>
    %226 = vector.broadcast %222 : vector<8x1xf32> to vector<8x16xf32>
    %227 = arith.mulf %225, %226 : vector<8x16xf32>
    %c0_97 = arith.constant 0 : index
    %c0_98 = arith.constant 0 : index
    %c32 = arith.constant 32 : index
    %228 = vector.load %arg8[%c0_97, %c0_98, %c32] : memref<1x8x128xf32, #tpu.memory_space<vmem>>, vector<1x8x16xf32>
    %229 = vector.shape_cast %228 : vector<1x8x16xf32> to vector<8x16xf32>
    %230 = vector.shape_cast %227 : vector<8x16xf32> to vector<1x8x16xf32>
    tpu.vector_store %arg8[%c0_97, %c0_98, %c32], %230 {strides = array<i32>} : memref<1x8x128xf32, #tpu.memory_space<vmem>>, vector<1x8x16xf32>,
    %c0_99 = arith.constant 0 : index
    %c3 = arith.constant 3 : index
    %231 = memref.load %arg7[%c0_99, %c3] : memref<3x32xf32, #tpu.memory_space<smem>>
    %232 = vector.broadcast %231 : f32 to vector<8x8xf32>
    %233 = arith.mulf %17, %232 : vector<8x8xf32>
    %c0_100 = arith.constant 0 : index
    %c11 = arith.constant 11 : index
    %234 = memref.load %arg7[%c0_100, %c11] : memref<3x32xf32, #tpu.memory_space<smem>>
    %235 = vector.broadcast %234 : f32 to vector<8x8xf32>
    %236 = arith.mulf %20, %235 : vector<8x8xf32>
    %237 = arith.addf %233, %236 : vector<8x8xf32>
    %c0_101 = arith.constant 0 : index
    %c19 = arith.constant 19 : index
    %238 = memref.load %arg7[%c0_101, %c19] : memref<3x32xf32, #tpu.memory_space<smem>>
    %239 = vector.broadcast %238 : f32 to vector<8x8xf32>
    %240 = arith.mulf %23, %239 : vector<8x8xf32>
    %241 = arith.addf %237, %240 : vector<8x8xf32>
    %c0_102 = arith.constant 0 : index
    %c27 = arith.constant 27 : index
    %242 = memref.load %arg7[%c0_102, %c27] : memref<3x32xf32, #tpu.memory_space<smem>>
    %243 = vector.broadcast %242 : f32 to vector<8x8xf32>
    %244 = arith.mulf %26, %243 : vector<8x8xf32>
    %245 = arith.addf %241, %244 : vector<8x8xf32>
    %246 = arith.mulf %28, %245 : vector<8x8xf32>
    %c1_103 = arith.constant 1 : index
    %c3_104 = arith.constant 3 : index
    %247 = memref.load %arg7[%c1_103, %c3_104] : memref<3x32xf32, #tpu.memory_space<smem>>
    %248 = vector.broadcast %247 : f32 to vector<8x8xf32>
    %249 = arith.mulf %17, %248 : vector<8x8xf32>
    %c1_105 = arith.constant 1 : index
    %c11_106 = arith.constant 11 : index
    %250 = memref.load %arg7[%c1_105, %c11_106] : memref<3x32xf32, #tpu.memory_space<smem>>
    %251 = vector.broadcast %250 : f32 to vector<8x8xf32>
    %252 = arith.mulf %20, %251 : vector<8x8xf32>
    %253 = arith.addf %249, %252 : vector<8x8xf32>
    %c1_107 = arith.constant 1 : index
    %c19_108 = arith.constant 19 : index
    %254 = memref.load %arg7[%c1_107, %c19_108] : memref<3x32xf32, #tpu.memory_space<smem>>
    %255 = vector.broadcast %254 : f32 to vector<8x8xf32>
    %256 = arith.mulf %23, %255 : vector<8x8xf32>
    %257 = arith.addf %253, %256 : vector<8x8xf32>
    %c1_109 = arith.constant 1 : index
    %c27_110 = arith.constant 27 : index
    %258 = memref.load %arg7[%c1_109, %c27_110] : memref<3x32xf32, #tpu.memory_space<smem>>
    %259 = vector.broadcast %258 : f32 to vector<8x8xf32>
    %260 = arith.mulf %26, %259 : vector<8x8xf32>
    %261 = arith.addf %257, %260 : vector<8x8xf32>
    %262 = arith.mulf %30, %261 : vector<8x8xf32>
    %263 = arith.addf %246, %262 : vector<8x8xf32>
    %c2_111 = arith.constant 2 : index
    %c3_112 = arith.constant 3 : index
    %264 = memref.load %arg7[%c2_111, %c3_112] : memref<3x32xf32, #tpu.memory_space<smem>>
    %265 = vector.broadcast %264 : f32 to vector<8x8xf32>
    %266 = arith.mulf %17, %265 : vector<8x8xf32>
    %c2_113 = arith.constant 2 : index
    %c11_114 = arith.constant 11 : index
    %267 = memref.load %arg7[%c2_113, %c11_114] : memref<3x32xf32, #tpu.memory_space<smem>>
    %268 = vector.broadcast %267 : f32 to vector<8x8xf32>
    %269 = arith.mulf %20, %268 : vector<8x8xf32>
    %270 = arith.addf %266, %269 : vector<8x8xf32>
    %c2_115 = arith.constant 2 : index
    %c19_116 = arith.constant 19 : index
    %271 = memref.load %arg7[%c2_115, %c19_116] : memref<3x32xf32, #tpu.memory_space<smem>>
    %272 = vector.broadcast %271 : f32 to vector<8x8xf32>
    %273 = arith.mulf %23, %272 : vector<8x8xf32>
    %274 = arith.addf %270, %273 : vector<8x8xf32>
    %c2_117 = arith.constant 2 : index
    %c27_118 = arith.constant 27 : index
    %275 = memref.load %arg7[%c2_117, %c27_118] : memref<3x32xf32, #tpu.memory_space<smem>>
    %276 = vector.broadcast %275 : f32 to vector<8x8xf32>
    %277 = arith.mulf %26, %276 : vector<8x8xf32>
    %278 = arith.addf %274, %277 : vector<8x8xf32>
    %279 = arith.mulf %32, %278 : vector<8x8xf32>
    %280 = arith.addf %263, %279 : vector<8x8xf32>
    %cst_119 = arith.constant dense<0xFF800000> : vector<8xf32>
    %281 = vector.multi_reduction <maximumf>, %280, %cst_119 [1] : vector<8x8xf32> to vector<8xf32>
    %282 = vector.shape_cast %281 : vector<8xf32> to vector<8x1xf32>
    %283 = vector.broadcast %282 : vector<8x1xf32> to vector<8x8xf32>
    %284 = arith.subf %280, %283 : vector<8x8xf32>
    %285 = math.exp %284 : vector<8x8xf32>
    %cst_120 = arith.constant dense<0.000000e+00> : vector<8xf32>
    %286 = vector.multi_reduction <add>, %285, %cst_120 [1] : vector<8x8xf32> to vector<8xf32>
    %287 = vector.shape_cast %286 : vector<8xf32> to vector<8x1xf32>
    %288 = tpu.reciprocal %287 {approx = true} : vector<8x1xf32> -> vector<8x1xf32>
    %289 = arith.truncf %285 : vector<8x8xf32> to vector<8x8xbf16>
    %290 = vector.extract_strided_slice %14 {offsets = [0, 48], sizes = [8, 16], strides = [1, 1]} : vector<8x128xbf16> to vector<8x16xbf16>
    %cst_121 = arith.constant dense<0.000000e+00> : vector<8x16xf32>
    %291 = tpu.matmul %289, %290, %cst_121 {dimension_numbers = #tpu.dot_dimension_numbers<[1], [0], [0], [1], [0, 0, 1, 1], [], []>} : vector<8x8xbf16>, vector<8x16xbf16>, vector<8x16xf32> -> vector<8x16xf32>
    %292 = vector.broadcast %288 : vector<8x1xf32> to vector<8x16xf32>
    %293 = arith.mulf %291, %292 : vector<8x16xf32>
    %c0_122 = arith.constant 0 : index
    %c0_123 = arith.constant 0 : index
    %c48 = arith.constant 48 : index
    %294 = vector.load %arg8[%c0_122, %c0_123, %c48] : memref<1x8x128xf32, #tpu.memory_space<vmem>>, vector<1x8x16xf32>
    %295 = vector.shape_cast %294 : vector<1x8x16xf32> to vector<8x16xf32>
    %296 = vector.shape_cast %293 : vector<8x16xf32> to vector<1x8x16xf32>
    tpu.vector_store %arg8[%c0_122, %c0_123, %c48], %296 {strides = array<i32>} : memref<1x8x128xf32, #tpu.memory_space<vmem>>, vector<1x8x16xf32>,
    %c0_124 = arith.constant 0 : index
    %c4 = arith.constant 4 : index
    %297 = memref.load %arg7[%c0_124, %c4] : memref<3x32xf32, #tpu.memory_space<smem>>
    %298 = vector.broadcast %297 : f32 to vector<8x8xf32>
    %299 = arith.mulf %17, %298 : vector<8x8xf32>
    %c0_125 = arith.constant 0 : index
    %c12 = arith.constant 12 : index
    %300 = memref.load %arg7[%c0_125, %c12] : memref<3x32xf32, #tpu.memory_space<smem>>
    %301 = vector.broadcast %300 : f32 to vector<8x8xf32>
    %302 = arith.mulf %20, %301 : vector<8x8xf32>
    %303 = arith.addf %299, %302 : vector<8x8xf32>
    %c0_126 = arith.constant 0 : index
    %c20 = arith.constant 20 : index
    %304 = memref.load %arg7[%c0_126, %c20] : memref<3x32xf32, #tpu.memory_space<smem>>
    %305 = vector.broadcast %304 : f32 to vector<8x8xf32>
    %306 = arith.mulf %23, %305 : vector<8x8xf32>
    %307 = arith.addf %303, %306 : vector<8x8xf32>
    %c0_127 = arith.constant 0 : index
    %c28 = arith.constant 28 : index
    %308 = memref.load %arg7[%c0_127, %c28] : memref<3x32xf32, #tpu.memory_space<smem>>
    %309 = vector.broadcast %308 : f32 to vector<8x8xf32>
    %310 = arith.mulf %26, %309 : vector<8x8xf32>
    %311 = arith.addf %307, %310 : vector<8x8xf32>
    %312 = arith.mulf %28, %311 : vector<8x8xf32>
    %c1_128 = arith.constant 1 : index
    %c4_129 = arith.constant 4 : index
    %313 = memref.load %arg7[%c1_128, %c4_129] : memref<3x32xf32, #tpu.memory_space<smem>>
    %314 = vector.broadcast %313 : f32 to vector<8x8xf32>
    %315 = arith.mulf %17, %314 : vector<8x8xf32>
    %c1_130 = arith.constant 1 : index
    %c12_131 = arith.constant 12 : index
    %316 = memref.load %arg7[%c1_130, %c12_131] : memref<3x32xf32, #tpu.memory_space<smem>>
    %317 = vector.broadcast %316 : f32 to vector<8x8xf32>
    %318 = arith.mulf %20, %317 : vector<8x8xf32>
    %319 = arith.addf %315, %318 : vector<8x8xf32>
    %c1_132 = arith.constant 1 : index
    %c20_133 = arith.constant 20 : index
    %320 = memref.load %arg7[%c1_132, %c20_133] : memref<3x32xf32, #tpu.memory_space<smem>>
    %321 = vector.broadcast %320 : f32 to vector<8x8xf32>
    %322 = arith.mulf %23, %321 : vector<8x8xf32>
    %323 = arith.addf %319, %322 : vector<8x8xf32>
    %c1_134 = arith.constant 1 : index
    %c28_135 = arith.constant 28 : index
    %324 = memref.load %arg7[%c1_134, %c28_135] : memref<3x32xf32, #tpu.memory_space<smem>>
    %325 = vector.broadcast %324 : f32 to vector<8x8xf32>
    %326 = arith.mulf %26, %325 : vector<8x8xf32>
    %327 = arith.addf %323, %326 : vector<8x8xf32>
    %328 = arith.mulf %30, %327 : vector<8x8xf32>
    %329 = arith.addf %312, %328 : vector<8x8xf32>
    %c2_136 = arith.constant 2 : index
    %c4_137 = arith.constant 4 : index
    %330 = memref.load %arg7[%c2_136, %c4_137] : memref<3x32xf32, #tpu.memory_space<smem>>
    %331 = vector.broadcast %330 : f32 to vector<8x8xf32>
    %332 = arith.mulf %17, %331 : vector<8x8xf32>
    %c2_138 = arith.constant 2 : index
    %c12_139 = arith.constant 12 : index
    %333 = memref.load %arg7[%c2_138, %c12_139] : memref<3x32xf32, #tpu.memory_space<smem>>
    %334 = vector.broadcast %333 : f32 to vector<8x8xf32>
    %335 = arith.mulf %20, %334 : vector<8x8xf32>
    %336 = arith.addf %332, %335 : vector<8x8xf32>
    %c2_140 = arith.constant 2 : index
    %c20_141 = arith.constant 20 : index
    %337 = memref.load %arg7[%c2_140, %c20_141] : memref<3x32xf32, #tpu.memory_space<smem>>
    %338 = vector.broadcast %337 : f32 to vector<8x8xf32>
    %339 = arith.mulf %23, %338 : vector<8x8xf32>
    %340 = arith.addf %336, %339 : vector<8x8xf32>
    %c2_142 = arith.constant 2 : index
    %c28_143 = arith.constant 28 : index
    %341 = memref.load %arg7[%c2_142, %c28_143] : memref<3x32xf32, #tpu.memory_space<smem>>
    %342 = vector.broadcast %341 : f32 to vector<8x8xf32>
    %343 = arith.mulf %26, %342 : vector<8x8xf32>
    %344 = arith.addf %340, %343 : vector<8x8xf32>
    %345 = arith.mulf %32, %344 : vector<8x8xf32>
    %346 = arith.addf %329, %345 : vector<8x8xf32>
    %cst_144 = arith.constant dense<0xFF800000> : vector<8xf32>
    %347 = vector.multi_reduction <maximumf>, %346, %cst_144 [1] : vector<8x8xf32> to vector<8xf32>
    %348 = vector.shape_cast %347 : vector<8xf32> to vector<8x1xf32>
    %349 = vector.broadcast %348 : vector<8x1xf32> to vector<8x8xf32>
    %350 = arith.subf %346, %349 : vector<8x8xf32>
    %351 = math.exp %350 : vector<8x8xf32>
    %cst_145 = arith.constant dense<0.000000e+00> : vector<8xf32>
    %352 = vector.multi_reduction <add>, %351, %cst_145 [1] : vector<8x8xf32> to vector<8xf32>
    %353 = vector.shape_cast %352 : vector<8xf32> to vector<8x1xf32>
    %354 = tpu.reciprocal %353 {approx = true} : vector<8x1xf32> -> vector<8x1xf32>
    %355 = arith.truncf %351 : vector<8x8xf32> to vector<8x8xbf16>
    %356 = vector.extract_strided_slice %14 {offsets = [0, 64], sizes = [8, 16], strides = [1, 1]} : vector<8x128xbf16> to vector<8x16xbf16>
    %cst_146 = arith.constant dense<0.000000e+00> : vector<8x16xf32>
    %357 = tpu.matmul %355, %356, %cst_146 {dimension_numbers = #tpu.dot_dimension_numbers<[1], [0], [0], [1], [0, 0, 1, 1], [], []>} : vector<8x8xbf16>, vector<8x16xbf16>, vector<8x16xf32> -> vector<8x16xf32>
    %358 = vector.broadcast %354 : vector<8x1xf32> to vector<8x16xf32>
    %359 = arith.mulf %357, %358 : vector<8x16xf32>
    %c0_147 = arith.constant 0 : index
    %c0_148 = arith.constant 0 : index
    %c64 = arith.constant 64 : index
    %360 = vector.load %arg8[%c0_147, %c0_148, %c64] : memref<1x8x128xf32, #tpu.memory_space<vmem>>, vector<1x8x16xf32>
    %361 = vector.shape_cast %360 : vector<1x8x16xf32> to vector<8x16xf32>
    %362 = vector.shape_cast %359 : vector<8x16xf32> to vector<1x8x16xf32>
    tpu.vector_store %arg8[%c0_147, %c0_148, %c64], %362 {strides = array<i32>} : memref<1x8x128xf32, #tpu.memory_space<vmem>>, vector<1x8x16xf32>,
    %c0_149 = arith.constant 0 : index
    %c5 = arith.constant 5 : index
    %363 = memref.load %arg7[%c0_149, %c5] : memref<3x32xf32, #tpu.memory_space<smem>>
    %364 = vector.broadcast %363 : f32 to vector<8x8xf32>
    %365 = arith.mulf %17, %364 : vector<8x8xf32>
    %c0_150 = arith.constant 0 : index
    %c13 = arith.constant 13 : index
    %366 = memref.load %arg7[%c0_150, %c13] : memref<3x32xf32, #tpu.memory_space<smem>>
    %367 = vector.broadcast %366 : f32 to vector<8x8xf32>
    %368 = arith.mulf %20, %367 : vector<8x8xf32>
    %369 = arith.addf %365, %368 : vector<8x8xf32>
    %c0_151 = arith.constant 0 : index
    %c21 = arith.constant 21 : index
    %370 = memref.load %arg7[%c0_151, %c21] : memref<3x32xf32, #tpu.memory_space<smem>>
    %371 = vector.broadcast %370 : f32 to vector<8x8xf32>
    %372 = arith.mulf %23, %371 : vector<8x8xf32>
    %373 = arith.addf %369, %372 : vector<8x8xf32>
    %c0_152 = arith.constant 0 : index
    %c29 = arith.constant 29 : index
    %374 = memref.load %arg7[%c0_152, %c29] : memref<3x32xf32, #tpu.memory_space<smem>>
    %375 = vector.broadcast %374 : f32 to vector<8x8xf32>
    %376 = arith.mulf %26, %375 : vector<8x8xf32>
    %377 = arith.addf %373, %376 : vector<8x8xf32>
    %378 = arith.mulf %28, %377 : vector<8x8xf32>
    %c1_153 = arith.constant 1 : index
    %c5_154 = arith.constant 5 : index
    %379 = memref.load %arg7[%c1_153, %c5_154] : memref<3x32xf32, #tpu.memory_space<smem>>
    %380 = vector.broadcast %379 : f32 to vector<8x8xf32>
    %381 = arith.mulf %17, %380 : vector<8x8xf32>
    %c1_155 = arith.constant 1 : index
    %c13_156 = arith.constant 13 : index
    %382 = memref.load %arg7[%c1_155, %c13_156] : memref<3x32xf32, #tpu.memory_space<smem>>
    %383 = vector.broadcast %382 : f32 to vector<8x8xf32>
    %384 = arith.mulf %20, %383 : vector<8x8xf32>
    %385 = arith.addf %381, %384 : vector<8x8xf32>
    %c1_157 = arith.constant 1 : index
    %c21_158 = arith.constant 21 : index
    %386 = memref.load %arg7[%c1_157, %c21_158] : memref<3x32xf32, #tpu.memory_space<smem>>
    %387 = vector.broadcast %386 : f32 to vector<8x8xf32>
    %388 = arith.mulf %23, %387 : vector<8x8xf32>
    %389 = arith.addf %385, %388 : vector<8x8xf32>
    %c1_159 = arith.constant 1 : index
    %c29_160 = arith.constant 29 : index
    %390 = memref.load %arg7[%c1_159, %c29_160] : memref<3x32xf32, #tpu.memory_space<smem>>
    %391 = vector.broadcast %390 : f32 to vector<8x8xf32>
    %392 = arith.mulf %26, %391 : vector<8x8xf32>
    %393 = arith.addf %389, %392 : vector<8x8xf32>
    %394 = arith.mulf %30, %393 : vector<8x8xf32>
    %395 = arith.addf %378, %394 : vector<8x8xf32>
    %c2_161 = arith.constant 2 : index
    %c5_162 = arith.constant 5 : index
    %396 = memref.load %arg7[%c2_161, %c5_162] : memref<3x32xf32, #tpu.memory_space<smem>>
    %397 = vector.broadcast %396 : f32 to vector<8x8xf32>
    %398 = arith.mulf %17, %397 : vector<8x8xf32>
    %c2_163 = arith.constant 2 : index
    %c13_164 = arith.constant 13 : index
    %399 = memref.load %arg7[%c2_163, %c13_164] : memref<3x32xf32, #tpu.memory_space<smem>>
    %400 = vector.broadcast %399 : f32 to vector<8x8xf32>
    %401 = arith.mulf %20, %400 : vector<8x8xf32>
    %402 = arith.addf %398, %401 : vector<8x8xf32>
    %c2_165 = arith.constant 2 : index
    %c21_166 = arith.constant 21 : index
    %403 = memref.load %arg7[%c2_165, %c21_166] : memref<3x32xf32, #tpu.memory_space<smem>>
    %404 = vector.broadcast %403 : f32 to vector<8x8xf32>
    %405 = arith.mulf %23, %404 : vector<8x8xf32>
    %406 = arith.addf %402, %405 : vector<8x8xf32>
    %c2_167 = arith.constant 2 : index
    %c29_168 = arith.constant 29 : index
    %407 = memref.load %arg7[%c2_167, %c29_168] : memref<3x32xf32, #tpu.memory_space<smem>>
    %408 = vector.broadcast %407 : f32 to vector<8x8xf32>
    %409 = arith.mulf %26, %408 : vector<8x8xf32>
    %410 = arith.addf %406, %409 : vector<8x8xf32>
    %411 = arith.mulf %32, %410 : vector<8x8xf32>
    %412 = arith.addf %395, %411 : vector<8x8xf32>
    %cst_169 = arith.constant dense<0xFF800000> : vector<8xf32>
    %413 = vector.multi_reduction <maximumf>, %412, %cst_169 [1] : vector<8x8xf32> to vector<8xf32>
    %414 = vector.shape_cast %413 : vector<8xf32> to vector<8x1xf32>
    %415 = vector.broadcast %414 : vector<8x1xf32> to vector<8x8xf32>
    %416 = arith.subf %412, %415 : vector<8x8xf32>
    %417 = math.exp %416 : vector<8x8xf32>
    %cst_170 = arith.constant dense<0.000000e+00> : vector<8xf32>
    %418 = vector.multi_reduction <add>, %417, %cst_170 [1] : vector<8x8xf32> to vector<8xf32>
    %419 = vector.shape_cast %418 : vector<8xf32> to vector<8x1xf32>
    %420 = tpu.reciprocal %419 {approx = true} : vector<8x1xf32> -> vector<8x1xf32>
    %421 = arith.truncf %417 : vector<8x8xf32> to vector<8x8xbf16>
    %422 = vector.extract_strided_slice %14 {offsets = [0, 80], sizes = [8, 16], strides = [1, 1]} : vector<8x128xbf16> to vector<8x16xbf16>
    %cst_171 = arith.constant dense<0.000000e+00> : vector<8x16xf32>
    %423 = tpu.matmul %421, %422, %cst_171 {dimension_numbers = #tpu.dot_dimension_numbers<[1], [0], [0], [1], [0, 0, 1, 1], [], []>} : vector<8x8xbf16>, vector<8x16xbf16>, vector<8x16xf32> -> vector<8x16xf32>
    %424 = vector.broadcast %420 : vector<8x1xf32> to vector<8x16xf32>
    %425 = arith.mulf %423, %424 : vector<8x16xf32>
    %c0_172 = arith.constant 0 : index
    %c0_173 = arith.constant 0 : index
    %c80 = arith.constant 80 : index
    %426 = vector.load %arg8[%c0_172, %c0_173, %c80] : memref<1x8x128xf32, #tpu.memory_space<vmem>>, vector<1x8x16xf32>
    %427 = vector.shape_cast %426 : vector<1x8x16xf32> to vector<8x16xf32>
    %428 = vector.shape_cast %425 : vector<8x16xf32> to vector<1x8x16xf32>
    tpu.vector_store %arg8[%c0_172, %c0_173, %c80], %428 {strides = array<i32>} : memref<1x8x128xf32, #tpu.memory_space<vmem>>, vector<1x8x16xf32>,
    %c0_174 = arith.constant 0 : index
    %c6 = arith.constant 6 : index
    %429 = memref.load %arg7[%c0_174, %c6] : memref<3x32xf32, #tpu.memory_space<smem>>
    %430 = vector.broadcast %429 : f32 to vector<8x8xf32>
    %431 = arith.mulf %17, %430 : vector<8x8xf32>
    %c0_175 = arith.constant 0 : index
    %c14 = arith.constant 14 : index
    %432 = memref.load %arg7[%c0_175, %c14] : memref<3x32xf32, #tpu.memory_space<smem>>
    %433 = vector.broadcast %432 : f32 to vector<8x8xf32>
    %434 = arith.mulf %20, %433 : vector<8x8xf32>
    %435 = arith.addf %431, %434 : vector<8x8xf32>
    %c0_176 = arith.constant 0 : index
    %c22 = arith.constant 22 : index
    %436 = memref.load %arg7[%c0_176, %c22] : memref<3x32xf32, #tpu.memory_space<smem>>
    %437 = vector.broadcast %436 : f32 to vector<8x8xf32>
    %438 = arith.mulf %23, %437 : vector<8x8xf32>
    %439 = arith.addf %435, %438 : vector<8x8xf32>
    %c0_177 = arith.constant 0 : index
    %c30 = arith.constant 30 : index
    %440 = memref.load %arg7[%c0_177, %c30] : memref<3x32xf32, #tpu.memory_space<smem>>
    %441 = vector.broadcast %440 : f32 to vector<8x8xf32>
    %442 = arith.mulf %26, %441 : vector<8x8xf32>
    %443 = arith.addf %439, %442 : vector<8x8xf32>
    %444 = arith.mulf %28, %443 : vector<8x8xf32>
    %c1_178 = arith.constant 1 : index
    %c6_179 = arith.constant 6 : index
    %445 = memref.load %arg7[%c1_178, %c6_179] : memref<3x32xf32, #tpu.memory_space<smem>>
    %446 = vector.broadcast %445 : f32 to vector<8x8xf32>
    %447 = arith.mulf %17, %446 : vector<8x8xf32>
    %c1_180 = arith.constant 1 : index
    %c14_181 = arith.constant 14 : index
    %448 = memref.load %arg7[%c1_180, %c14_181] : memref<3x32xf32, #tpu.memory_space<smem>>
    %449 = vector.broadcast %448 : f32 to vector<8x8xf32>
    %450 = arith.mulf %20, %449 : vector<8x8xf32>
    %451 = arith.addf %447, %450 : vector<8x8xf32>
    %c1_182 = arith.constant 1 : index
    %c22_183 = arith.constant 22 : index
    %452 = memref.load %arg7[%c1_182, %c22_183] : memref<3x32xf32, #tpu.memory_space<smem>>
    %453 = vector.broadcast %452 : f32 to vector<8x8xf32>
    %454 = arith.mulf %23, %453 : vector<8x8xf32>
    %455 = arith.addf %451, %454 : vector<8x8xf32>
    %c1_184 = arith.constant 1 : index
    %c30_185 = arith.constant 30 : index
    %456 = memref.load %arg7[%c1_184, %c30_185] : memref<3x32xf32, #tpu.memory_space<smem>>
    %457 = vector.broadcast %456 : f32 to vector<8x8xf32>
    %458 = arith.mulf %26, %457 : vector<8x8xf32>
    %459 = arith.addf %455, %458 : vector<8x8xf32>
    %460 = arith.mulf %30, %459 : vector<8x8xf32>
    %461 = arith.addf %444, %460 : vector<8x8xf32>
    %c2_186 = arith.constant 2 : index
    %c6_187 = arith.constant 6 : index
    %462 = memref.load %arg7[%c2_186, %c6_187] : memref<3x32xf32, #tpu.memory_space<smem>>
    %463 = vector.broadcast %462 : f32 to vector<8x8xf32>
    %464 = arith.mulf %17, %463 : vector<8x8xf32>
    %c2_188 = arith.constant 2 : index
    %c14_189 = arith.constant 14 : index
    %465 = memref.load %arg7[%c2_188, %c14_189] : memref<3x32xf32, #tpu.memory_space<smem>>
    %466 = vector.broadcast %465 : f32 to vector<8x8xf32>
    %467 = arith.mulf %20, %466 : vector<8x8xf32>
    %468 = arith.addf %464, %467 : vector<8x8xf32>
    %c2_190 = arith.constant 2 : index
    %c22_191 = arith.constant 22 : index
    %469 = memref.load %arg7[%c2_190, %c22_191] : memref<3x32xf32, #tpu.memory_space<smem>>
    %470 = vector.broadcast %469 : f32 to vector<8x8xf32>
    %471 = arith.mulf %23, %470 : vector<8x8xf32>
    %472 = arith.addf %468, %471 : vector<8x8xf32>
    %c2_192 = arith.constant 2 : index
    %c30_193 = arith.constant 30 : index
    %473 = memref.load %arg7[%c2_192, %c30_193] : memref<3x32xf32, #tpu.memory_space<smem>>
    %474 = vector.broadcast %473 : f32 to vector<8x8xf32>
    %475 = arith.mulf %26, %474 : vector<8x8xf32>
    %476 = arith.addf %472, %475 : vector<8x8xf32>
    %477 = arith.mulf %32, %476 : vector<8x8xf32>
    %478 = arith.addf %461, %477 : vector<8x8xf32>
    %cst_194 = arith.constant dense<0xFF800000> : vector<8xf32>
    %479 = vector.multi_reduction <maximumf>, %478, %cst_194 [1] : vector<8x8xf32> to vector<8xf32>
    %480 = vector.shape_cast %479 : vector<8xf32> to vector<8x1xf32>
    %481 = vector.broadcast %480 : vector<8x1xf32> to vector<8x8xf32>
    %482 = arith.subf %478, %481 : vector<8x8xf32>
    %483 = math.exp %482 : vector<8x8xf32>
    %cst_195 = arith.constant dense<0.000000e+00> : vector<8xf32>
    %484 = vector.multi_reduction <add>, %483, %cst_195 [1] : vector<8x8xf32> to vector<8xf32>
    %485 = vector.shape_cast %484 : vector<8xf32> to vector<8x1xf32>
    %486 = tpu.reciprocal %485 {approx = true} : vector<8x1xf32> -> vector<8x1xf32>
    %487 = arith.truncf %483 : vector<8x8xf32> to vector<8x8xbf16>
    %488 = vector.extract_strided_slice %14 {offsets = [0, 96], sizes = [8, 16], strides = [1, 1]} : vector<8x128xbf16> to vector<8x16xbf16>
    %cst_196 = arith.constant dense<0.000000e+00> : vector<8x16xf32>
    %489 = tpu.matmul %487, %488, %cst_196 {dimension_numbers = #tpu.dot_dimension_numbers<[1], [0], [0], [1], [0, 0, 1, 1], [], []>} : vector<8x8xbf16>, vector<8x16xbf16>, vector<8x16xf32> -> vector<8x16xf32>
    %490 = vector.broadcast %486 : vector<8x1xf32> to vector<8x16xf32>
    %491 = arith.mulf %489, %490 : vector<8x16xf32>
    %c0_197 = arith.constant 0 : index
    %c0_198 = arith.constant 0 : index
    %c96 = arith.constant 96 : index
    %492 = vector.load %arg8[%c0_197, %c0_198, %c96] : memref<1x8x128xf32, #tpu.memory_space<vmem>>, vector<1x8x16xf32>
    %493 = vector.shape_cast %492 : vector<1x8x16xf32> to vector<8x16xf32>
    %494 = vector.shape_cast %491 : vector<8x16xf32> to vector<1x8x16xf32>
    tpu.vector_store %arg8[%c0_197, %c0_198, %c96], %494 {strides = array<i32>} : memref<1x8x128xf32, #tpu.memory_space<vmem>>, vector<1x8x16xf32>,
    %c0_199 = arith.constant 0 : index
    %c7 = arith.constant 7 : index
    %495 = memref.load %arg7[%c0_199, %c7] : memref<3x32xf32, #tpu.memory_space<smem>>
    %496 = vector.broadcast %495 : f32 to vector<8x8xf32>
    %497 = arith.mulf %17, %496 : vector<8x8xf32>
    %c0_200 = arith.constant 0 : index
    %c15 = arith.constant 15 : index
    %498 = memref.load %arg7[%c0_200, %c15] : memref<3x32xf32, #tpu.memory_space<smem>>
    %499 = vector.broadcast %498 : f32 to vector<8x8xf32>
    %500 = arith.mulf %20, %499 : vector<8x8xf32>
    %501 = arith.addf %497, %500 : vector<8x8xf32>
    %c0_201 = arith.constant 0 : index
    %c23 = arith.constant 23 : index
    %502 = memref.load %arg7[%c0_201, %c23] : memref<3x32xf32, #tpu.memory_space<smem>>
    %503 = vector.broadcast %502 : f32 to vector<8x8xf32>
    %504 = arith.mulf %23, %503 : vector<8x8xf32>
    %505 = arith.addf %501, %504 : vector<8x8xf32>
    %c0_202 = arith.constant 0 : index
    %c31 = arith.constant 31 : index
    %506 = memref.load %arg7[%c0_202, %c31] : memref<3x32xf32, #tpu.memory_space<smem>>
    %507 = vector.broadcast %506 : f32 to vector<8x8xf32>
    %508 = arith.mulf %26, %507 : vector<8x8xf32>
    %509 = arith.addf %505, %508 : vector<8x8xf32>
    %510 = arith.mulf %28, %509 : vector<8x8xf32>
    %c1_203 = arith.constant 1 : index
    %c7_204 = arith.constant 7 : index
    %511 = memref.load %arg7[%c1_203, %c7_204] : memref<3x32xf32, #tpu.memory_space<smem>>
    %512 = vector.broadcast %511 : f32 to vector<8x8xf32>
    %513 = arith.mulf %17, %512 : vector<8x8xf32>
    %c1_205 = arith.constant 1 : index
    %c15_206 = arith.constant 15 : index
    %514 = memref.load %arg7[%c1_205, %c15_206] : memref<3x32xf32, #tpu.memory_space<smem>>
    %515 = vector.broadcast %514 : f32 to vector<8x8xf32>
    %516 = arith.mulf %20, %515 : vector<8x8xf32>
    %517 = arith.addf %513, %516 : vector<8x8xf32>
    %c1_207 = arith.constant 1 : index
    %c23_208 = arith.constant 23 : index
    %518 = memref.load %arg7[%c1_207, %c23_208] : memref<3x32xf32, #tpu.memory_space<smem>>
    %519 = vector.broadcast %518 : f32 to vector<8x8xf32>
    %520 = arith.mulf %23, %519 : vector<8x8xf32>
    %521 = arith.addf %517, %520 : vector<8x8xf32>
    %c1_209 = arith.constant 1 : index
    %c31_210 = arith.constant 31 : index
    %522 = memref.load %arg7[%c1_209, %c31_210] : memref<3x32xf32, #tpu.memory_space<smem>>
    %523 = vector.broadcast %522 : f32 to vector<8x8xf32>
    %524 = arith.mulf %26, %523 : vector<8x8xf32>
    %525 = arith.addf %521, %524 : vector<8x8xf32>
    %526 = arith.mulf %30, %525 : vector<8x8xf32>
    %527 = arith.addf %510, %526 : vector<8x8xf32>
    %c2_211 = arith.constant 2 : index
    %c7_212 = arith.constant 7 : index
    %528 = memref.load %arg7[%c2_211, %c7_212] : memref<3x32xf32, #tpu.memory_space<smem>>
    %529 = vector.broadcast %528 : f32 to vector<8x8xf32>
    %530 = arith.mulf %17, %529 : vector<8x8xf32>
    %c2_213 = arith.constant 2 : index
    %c15_214 = arith.constant 15 : index
    %531 = memref.load %arg7[%c2_213, %c15_214] : memref<3x32xf32, #tpu.memory_space<smem>>
    %532 = vector.broadcast %531 : f32 to vector<8x8xf32>
    %533 = arith.mulf %20, %532 : vector<8x8xf32>
    %534 = arith.addf %530, %533 : vector<8x8xf32>
    %c2_215 = arith.constant 2 : index
    %c23_216 = arith.constant 23 : index
    %535 = memref.load %arg7[%c2_215, %c23_216] : memref<3x32xf32, #tpu.memory_space<smem>>
    %536 = vector.broadcast %535 : f32 to vector<8x8xf32>
    %537 = arith.mulf %23, %536 : vector<8x8xf32>
    %538 = arith.addf %534, %537 : vector<8x8xf32>
    %c2_217 = arith.constant 2 : index
    %c31_218 = arith.constant 31 : index
    %539 = memref.load %arg7[%c2_217, %c31_218] : memref<3x32xf32, #tpu.memory_space<smem>>
    %540 = vector.broadcast %539 : f32 to vector<8x8xf32>
    %541 = arith.mulf %26, %540 : vector<8x8xf32>
    %542 = arith.addf %538, %541 : vector<8x8xf32>
    %543 = arith.mulf %32, %542 : vector<8x8xf32>
    %544 = arith.addf %527, %543 : vector<8x8xf32>
    %cst_219 = arith.constant dense<0xFF800000> : vector<8xf32>
    %545 = vector.multi_reduction <maximumf>, %544, %cst_219 [1] : vector<8x8xf32> to vector<8xf32>
    %546 = vector.shape_cast %545 : vector<8xf32> to vector<8x1xf32>
    %547 = vector.broadcast %546 : vector<8x1xf32> to vector<8x8xf32>
    %548 = arith.subf %544, %547 : vector<8x8xf32>
    %549 = math.exp %548 : vector<8x8xf32>
    %cst_220 = arith.constant dense<0.000000e+00> : vector<8xf32>
    %550 = vector.multi_reduction <add>, %549, %cst_220 [1] : vector<8x8xf32> to vector<8xf32>
    %551 = vector.shape_cast %550 : vector<8xf32> to vector<8x1xf32>
    %552 = tpu.reciprocal %551 {approx = true} : vector<8x1xf32> -> vector<8x1xf32>
    %553 = arith.truncf %549 : vector<8x8xf32> to vector<8x8xbf16>
    %554 = vector.extract_strided_slice %14 {offsets = [0, 112], sizes = [8, 16], strides = [1, 1]} : vector<8x128xbf16> to vector<8x16xbf16>
    %cst_221 = arith.constant dense<0.000000e+00> : vector<8x16xf32>
    %555 = tpu.matmul %553, %554, %cst_221 {dimension_numbers = #tpu.dot_dimension_numbers<[1], [0], [0], [1], [0, 0, 1, 1], [], []>} : vector<8x8xbf16>, vector<8x16xbf16>, vector<8x16xf32> -> vector<8x16xf32>
    %556 = vector.broadcast %552 : vector<8x1xf32> to vector<8x16xf32>
    %557 = arith.mulf %555, %556 : vector<8x16xf32>
    %c0_222 = arith.constant 0 : index
    %c0_223 = arith.constant 0 : index
    %c112 = arith.constant 112 : index
    %558 = vector.load %arg8[%c0_222, %c0_223, %c112] : memref<1x8x128xf32, #tpu.memory_space<vmem>>, vector<1x8x16xf32>
    %559 = vector.shape_cast %558 : vector<1x8x16xf32> to vector<8x16xf32>
    %560 = vector.shape_cast %557 : vector<8x16xf32> to vector<1x8x16xf32>
    tpu.vector_store %arg8[%c0_222, %c0_223, %c112], %560 {strides = array<i32>} : memref<1x8x128xf32, #tpu.memory_space<vmem>>, vector<1x8x16xf32>,
    return
  }
  func.func @transform_0(%arg0: i32, %arg1: i32) -> (i32, i32, i32) {
    %c0_i32 = arith.constant 0 : i32
    %c0_i32_0 = arith.constant 0 : i32
    %c0_i32_1 = arith.constant 0 : i32
    return %arg0, %c0_i32, %c0_i32_0 : i32, i32, i32
  }
  func.func @transform_1(%arg0: i32, %arg1: i32) -> (i32, i32) {
    %c0_i32 = arith.constant 0 : i32
    %c0_i32_0 = arith.constant 0 : i32
    %c0_i32_1 = arith.constant 0 : i32
    return %c0_i32, %c0_i32_0 : i32, i32
  }
  func.func @transform_2(%arg0: i32, %arg1: i32) -> (i32, i32) {
    %c0_i32 = arith.constant 0 : i32
    %c0_i32_0 = arith.constant 0 : i32
    %c0_i32_1 = arith.constant 0 : i32
    return %c0_i32, %c0_i32_0 : i32, i32
  }
  func.func @transform_3(%arg0: i32, %arg1: i32) -> (i32, i32) {
    %c0_i32 = arith.constant 0 : i32
    %c0_i32_0 = arith.constant 0 : i32
    %c0_i32_1 = arith.constant 0 : i32
    return %c0_i32, %c0_i32_0 : i32, i32
  }
  func.func @transform_4(%arg0: i32, %arg1: i32) -> (i32, i32, i32) {
    %c0_i32 = arith.constant 0 : i32
    %c0_i32_0 = arith.constant 0 : i32
    %c0_i32_1 = arith.constant 0 : i32
    return %c0_i32, %arg1, %c0_i32_0 : i32, i32, i32
  }
  func.func @transform_5(%arg0: i32, %arg1: i32) -> (i32, i32) {
    %c0_i32 = arith.constant 0 : i32
    %c0_i32_0 = arith.constant 0 : i32
    %c0_i32_1 = arith.constant 0 : i32
    return %c0_i32, %c0_i32_0 : i32, i32
  }
  func.func @transform_6(%arg0: i32, %arg1: i32) -> (i32, i32, i32) {
    %c0_i32 = arith.constant 0 : i32
    %c0_i32_0 = arith.constant 0 : i32
    return %arg0, %arg1, %c0_i32 : i32, i32, i32
  }
}

</mosaic_0001>

<bundles_post_ra>
// kernel: tpu_custom_call.1
= control target key start
LH: loop header
LB: loop body
LE: loop exit
PB: predicated region body
PF: predicated region fallthrough
CT: control target
= control target key end

     0   :  { %s3404_s0 = inlined_call_operand.vmem [shape: f32[2,8,128], index: 0, kind: input, shape index: {}]   ;;  %s3405_s1 = inlined_call_operand.vmem [shape: f32[128,64], index: 1, kind: input, shape index: {}]   ;;  %s3406_s2 = inlined_call_operand.vmem [shape: f32[128,64], index: 2, kind: input, shape index: {}]   ;;  %s3407_s3 = inlined_call_operand.vmem [shape: f32[128,128], index: 3, kind: input, shape index: {}]   ;;  %s3408_s4 = inlined_call_operand.vmem [shape: f32[3,8,8], index: 4, kind: input, shape index: {}]   ;;  %s3409_s5 = inlined_call_operand.vmem [shape: f32[3,32], index: 5, kind: input, shape index: {}]   ;;  %s3410_s6 = inlined_call_operand.hbm [shape: f32[2,8,128], index: 6, kind: output, shape index: {}]  }
   0x1   :  { %3491 = sst [smem:[#allocation81_spill]] %s3404_s0 }
   0x2   :  { %3492 = sst [smem:[#allocation82_spill]] %s3405_s1 }
   0x3   :  { %3493 = sst [smem:[#allocation83_spill]] %s3406_s2 }
   0x4   :  { %3494 = sst [smem:[#allocation84_spill]] %s3407_s3 }
   0x5   :  { %3495 = sst [smem:[#allocation85_spill]] %s3408_s4 }
   0x6   :  { %3496 = sst [smem:[#allocation86_spill]] %s3409_s5 }
   0x7   :  { %3497 = sst [smem:[#allocation87_spill]] %s3410_s6 }
   0x8   :  { %11 = vsyncpa [#allocation6], 0 }
   0x9   :  { %12 = vsyncpa [#allocation5], 0 }
   0xa   :  { %14 = vsyncpa [#allocation5 + $0x1], 0  ;;  %s2307_s21 = smov 0   ;;  %s2309_s22 = smov 0  }
   0xb   :  { %s2311_s23 = smov 0   ;;  %s2313_s24 = smov 0  }
   0xc   :  { %s2315_s25 = smov 0   ;;  %s2317_s26 = smov 0  }
   0xd LB: > { %3498 = sst [smem:[#allocation10_spill]] %s2239_s21  ;;  %s1747_s27 = sadd.s32 4294967295, %s2259_s26   ;;  %s2259_s26 = sphi %s2317_s26, %s20_s26   ;;  %s2255_s25 = sphi %s2315_s25, %s3752_s25   ;;  %s2251_s24 = sphi %s2313_s24, %s3751_s24   ;;  %s2247_s23 = sphi %s2311_s23, %s3750_s23   ;;  %s2243_s22 = sphi %s2309_s22, %s3749_s22   ;;  %s2239_s21 = sphi %s2307_s21, %s3748_s21  }
   0xe   : > { %3499 = sst [smem:[#allocation11_spill]] %s2243_s22  ;;  %s1748_s28 = sadd.s32 4294967294, %s2259_s26  }
   0xf   : > { %3500 = sst [smem:[#allocation12_spill]] %s2247_s23  ;;  %s32_s29 = sadd.s32 1, %s2255_s25 }
  0x10   : > { %3501 = sst [smem:[#allocation13_spill]] %s2251_s24  ;;  %s177_s30 = sadd.s32 1, %s2247_s23 }
  0x11   : > { %3502 = sst [smem:[#allocation14_spill]] %s2255_s25  ;;  %p34_p0 = scmp.ge.s32.totalorder %s32_s29, 2 }
  0x12   : > { %3503 = sst [smem:[#allocation15_spill]] %s2259_s26  ;;  %p187_p1 = scmp.ne.s32.totalorder %s2247_s23, %s2243_s22 }
  0x13   : > { %p188_p2 = scmp.eq.s32.totalorder %s1747_s27, 1  ;;  %p193_p3 = scmp.ne.s32.totalorder %s2243_s22, %s2239_s21 }
  0x14   : > { %s3754_s29 = smov (%p34_p0, %s32_s29), 0  ;;  %p194_p5 = scmp.eq.s32.totalorder %s1748_s28, 1 }
  0x15   : > { %3504 = sst [smem:[#allocation16_spill]] %s3754_s29  ;;  %p2347_p4 = por %p188_p2, %p187_p1 }
  0x16   : > { %s172_s8 = ssub.s32 %s2255_s25, %s3754_s29  ;;  %p1749_p6 = scmp.ge.s32.totalorder %s2259_s26, 1 }
  0x17   : > { %s3505_s7 = scalar_select %p2347_p4, 1, 0 }
  0x18   : > { %p175_p7 = scmp.eq.s32.totalorder %s172_s8, 0  ;;  %p2354_p8 = por %p194_p5, %p193_p3 }
  0x19   : > { %3506 = sst [smem:[#allocation17_spill]] %s3505_s7  ;;  %p201_p9 = scmp.lt.s32.totalorder %s2259_s26, 3 }
  0x1a   : > { %s3507_s9 = scalar_select %p2354_p8, 1, 0 }
  0x1b   : > { %s2360_s10 = scalar_select %p175_p7, %s2247_s23, %s177_s30  }
  0x1c   : > { %3508 = sst [smem:[#allocation18_spill]] %s3507_s9  ;;  %p2362_p10 = pnand %p1749_p6, %p201_p9 }
  0x1d   : > { %3509 = sst [smem:[#allocation19_spill]] %s2360_s10  ;;  %p2366_p11 = scmp.eq.s32.totalorder %s1747_s27, 0 }
  0x1e   : > { %s3512_s5 = sld [smem:[#allocation86_spill]]  ;;  %p2061_p12 = pneg %p2362_p10 }
  0x20   : > { %p2062_p13 = pnand %p2366_p11, %p2061_p12 }
  0x22   : > { %p2166_p1 = pneg %p2062_p13 }
  0x24   : > { %s230_s15 = sshll.u32 %s3512_s5, 4  ;;  %s231_s15 = int_to_ptr.vmem [resolvable:$true] %s230_s15 }
  0x25   : > { %s2164_s16 = scalar_lea.vmem %s231_s15, 64  ;;  %p2172_p5 = scmp.lt.s32.totalorder %s231_s15, %s231_s15 }
  0x26   : > { %p2165_p0 = scmp.ne.s32.totalorder %s231_s15, %s2164_s16  ;;  %p2173_p6 = scmp.lt.s32.totalorder %s2164_s16, %s2164_s16 }
  0x28   : > { %p2167_p2 = pnand %p2166_p1, %p2165_p0  ;;  %p2174_p7 = por %p2173_p6, %p2172_p5 }
  0x2a   : > { %p2168_p3 = pneg %p2167_p2 }
  0x2c   : > { %p2175_p9 = pnand %p2174_p7, %p2168_p3 }
  0x2e   : > { %2178 = shalt.err (!%p2175_p9)
}
  0x2f   : > { %s2261_s17 = smov [#allocation4]   ;;  %250 = sbr.rel (%p2362_p10) target bundleno = 1209 (0x4b9), region = 44 }
  0x30   : > { %2064 = dma.vmem_to_smem (!%p2062_p13), %s231_s15, 64, %s2261_s17, [#allocation6]  }
  0x34   : > { %2230 = dma.done.wait (%p2366_p11), [#allocation6], 64  }
  0x35   : > { %2232 = vsyncadd (%p2366_p11), [#allocation6], 4294967232 }
  0x36   : > { %256 = sfence }
  0x37   : > { %s3513_s2 = sld [smem:[#allocation83_spill]]  ;;  %v3482_v3 = vmov 0.0   ;;  %vm2263_vm0 = vmmov 0   ;;  %p284_p10 = scmp.lt.s32.totalorder %s2251_s24, 1  ;;  %vm364_vm1 = vcmask 519168   ;;  %vm503_vm2 = vcmask 130048  }
  0x38   : > { %1923 = vmatprep.subr.bf16.mxu0 %v3482_v3  ;;  %1939 = vmatprep.mubr.msk.bf16.mxu0 %vm2263_vm0, %v3482_v3  ;;  %s3514_s3 = sld [smem:[#allocation84_spill]]  ;;  %s3412_s28 = smov 96   ;;  %vm774_vm3 = vcmask 1043456   ;;  %vm759_vm4 = vcmask 64512   ;;  %vm937_vm5 = vcmask 261248   ;;  %vm1053_vm6 = vcmask 392448  }
  0x39   : > { %1943 = vmatprep.subr.bf16.mxu1 %v3482_v3  ;;  %1959 = vmatprep.mubr.msk.bf16.mxu1 %vm2263_vm0, %v3482_v3  ;;  %s285_s12 = scalar_select %p284_p10, %s2251_s24, 1  ;;  %vm1169_vm7 = vcmask 523648   ;;  %vm1285_vm8 = vcmask 654848   ;;  %vm1401_vm9 = vcmask 786048   ;;  %vm1517_vm10 = vcmask 917248  }
  0x3a   : > { %s3515_s0 = sld [smem:[#allocation81_spill]]  ;;  %s3411_s30 = smov 112   ;;  %vm1633_vm11 = vcmask 1048448  }
  0x3b   : > { %s1756_s27 = sshll.u32 %s285_s12, 3  ;;  %s3516_s1 = sld [smem:[#allocation82_spill]] }
  0x3c   : > { %s2606_s8 = sld [smem:[#allocation4 + $0x1]] }
  0x3d   : > { %v313_v0 = vld [vmem:[%s3513_s2 + $0x70] sm:$0xff]  ;;  %v314_v1 = vld [vmem:[%s3513_s2 + $0x78] sm:$0xff]  ;;  %v311_v2 = vld [vmem:[%s3513_s2 + $0x60] sm:$0xff]  ;;  %s2608_s11 = sld [smem:[#allocation4 + $0x81]] }
  0x3e   : > { %v322_v4 = vpack.c.bf16 %v314_v1, %v313_v0  ;;  %v312_v5 = vld [vmem:[%s3513_s2 + $0x68] sm:$0xff]  ;;  %v309_v7 = vld [vmem:[%s3513_s2 + $0x50] sm:$0xff]  ;;  %v310_v8 = vld [vmem:[%s3513_s2 + $0x58] sm:$0xff]  ;;  %s2610_s13 = sld [smem:[#allocation4 + $0x101]] }
  0x3f   : > { %v321_v6 = vpack.c.bf16 %v312_v5, %v311_v2  ;;  %v320_v9 = vpack.c.bf16 %v310_v8, %v309_v7  ;;  %v307_v10 = vld [vmem:[%s3513_s2 + $0x40] sm:$0xff]  ;;  %v308_v11 = vld [vmem:[%s3513_s2 + $0x48] sm:$0xff]  ;;  %v380_v13 = vld [vmem:[%s3514_s3 + $0x70] sm:$0xff]  ;;  %s2612_s14 = sld [smem:[#allocation4]] }
  0x40   : > { %1924 = vmatpush3.bf16.msra.mxu0 %v322_v4  ;;  %v319_v12 = vpack.c.bf16 %v308_v11, %v307_v10  ;;  %v381_v14 = vld [vmem:[%s3514_s3 + $0x78] sm:$0xff]  ;;  %v378_v15 = vld [vmem:[%s3514_s3 + $0x60] sm:$0xff]  ;;  %v305_v16 = vld [vmem:[%s3513_s2 + $0x30] sm:$0xff]  ;;  %s287_s18 = scalar_lea.vmem %s3515_s0, %s1756_s27  ;;  %s3413_s27 = smov 80  }
  0x41   : > { %1925 = vmatprep.subr.bf16.mxu0 %v3482_v3  ;;  %v306_v17 = vld [vmem:[%s3513_s2 + $0x38] sm:$0xff]  ;;  %v389_v18 = vpack.c.bf16 %v381_v14, %v380_v13  ;;  %v379_v19 = vld [vmem:[%s3514_s3 + $0x68] sm:$0xff]  ;;  %v376_v22 = vld [vmem:[%s3514_s3 + $0x50] sm:$0xff]  ;;  %s2614_s12 = sld [smem:[#allocation4 + $0x80]] }
  0x42   : > { %v388_v20 = vpack.c.bf16 %v379_v19, %v378_v15  ;;  %v318_v21 = vpack.c.bf16 %v306_v17, %v305_v16  ;;  %v377_v23 = vld [vmem:[%s3514_s3 + $0x58] sm:$0xff]  ;;  %v303_v24 = vld [vmem:[%s3513_s2 + $0x20] sm:$0xff]  ;;  %v304_v25 = vld [vmem:[%s3513_s2 + $0x28] sm:$0xff]  ;;  %s2616_s15 = sld [smem:[#allocation4 + $0x100]] }
  0x43   : > { %1944 = vmatpush3.bf16.msra.mxu1 %v389_v18  ;;  %v387_v26 = vpack.c.bf16 %v377_v23, %v376_v22  ;;  %v317_v27 = vpack.c.bf16 %v304_v25, %v303_v24  ;;  %v374_v28 = vld [vmem:[%s3514_s3 + $0x40] sm:$0xff]  ;;  %v375_v29 = vld [vmem:[%s3514_s3 + $0x48] sm:$0xff]  ;;  %v301_v30 = vld [vmem:[%s3513_s2 + $0x10] sm:$0xff]  ;;  %s2618_s16 = sld [smem:[#allocation4 + $0x2]] }
  0x44   : > { %1926 = vmatpush3.bf16.msra.mxu0 %v321_v6  ;;  %1945 = vmatprep.subr.bf16.mxu1 %v3482_v3  ;;  %v302_v31 = vld [vmem:[%s3513_s2 + $0x18] sm:$0xff]  ;;  %v386_v32 = vpack.c.bf16 %v375_v29, %v374_v28  ;;  %v372_v34 = vld [vmem:[%s3514_s3 + $0x30] sm:$0xff]  ;;  %v299_v36 = vld [vmem:[%s3513_s2] sm:$0xff]  ;;  %s2620_s17 = sld [smem:[#allocation4 + $0x82]] }
  0x45   : > { %1927 = vmatprep.subr.bf16.mxu0 %v3482_v3  ;;  %v316_v33 = vpack.c.bf16 %v302_v31, %v301_v30  ;;  %v373_v35 = vld [vmem:[%s3514_s3 + $0x38] sm:$0xff]  ;;  %v300_v37 = vld [vmem:[%s3513_s2 + $0x8] sm:$0xff]  ;;  %v297_v40 = vld [vmem:[%s287_s18] sm:$0xff]  ;;  %s2622_s18 = sld [smem:[#allocation4 + $0x102]] }
  0x46   : > { %v385_v38 = vpack.c.bf16 %v373_v35, %v372_v34  ;;  %v315_v39 = vpack.c.bf16 %v300_v37, %v299_v36  ;;  %v450_v41 = vld [vmem:[%s3516_s1 + $0x70] sm:$0xff]  ;;  %v451_v42 = vld [vmem:[%s3516_s1 + $0x78] sm:$0xff]  ;;  %v298_v43 = vpack.c.bf16 %v297_v40, %v297_v40  ;;  %v448_v45 = vld [vmem:[%s3516_s1 + $0x60] sm:$0xff]  ;;  %s2624_s19 = sld [smem:[#allocation4 + $0x3]] }
  0x47   : > { %1946 = vmatpush3.bf16.msra.mxu1 %v388_v20  ;;  %v459_v44 = vpack.c.bf16 %v451_v42, %v450_v41  ;;  %v449_v46 = vld [vmem:[%s3516_s1 + $0x68] sm:$0xff]  ;;  %v446_v48 = vld [vmem:[%s3516_s1 + $0x50] sm:$0xff]  ;;  %v447_v49 = vld [vmem:[%s3516_s1 + $0x58] sm:$0xff]  ;;  %s2626_s20 = sld [smem:[#allocation4 + $0x83]] }
  0x48   : > { %1928 = vmatpush3.bf16.msra.mxu0 %v320_v9  ;;  %1947 = vmatprep.subr.bf16.mxu1 %v3482_v3  ;;  %v458_v47 = vpack.c.bf16 %v449_v46, %v448_v45  ;;  %v457_v50 = vpack.c.bf16 %v447_v49, %v446_v48  ;;  %v444_v51 = vld [vmem:[%s3516_s1 + $0x40] sm:$0xff]  ;;  %v445_v52 = vld [vmem:[%s3516_s1 + $0x48] sm:$0xff]  ;;  %v442_v54 = vld [vmem:[%s3516_s1 + $0x30] sm:$0xff]  ;;  %s2634_s0 = sld [smem:[#allocation4 + $0x105]]  ;;  %v821_v48 = vstv %s2606_s8 }
  0x49   : > { %1929 = vmatprep.subr.bf16.mxu0 %v3482_v3  ;;  %v456_v53 = vpack.c.bf16 %v445_v52, %v444_v51  ;;  %v443_v55 = vld [vmem:[%s3516_s1 + $0x38] sm:$0xff]  ;;  %v440_v57 = vld [vmem:[%s3516_s1 + $0x20] sm:$0xff]  ;;  %v441_v58 = vld [vmem:[%s3516_s1 + $0x28] sm:$0xff]  ;;  %s2638_s2 = sld [smem:[#allocation4 + $0x84]]  ;;  %v837_v49 = vstv %s2608_s11 }
  0x4a   : > { %v455_v56 = vpack.c.bf16 %v443_v55, %v442_v54  ;;  %v454_v59 = vpack.c.bf16 %v441_v58, %v440_v57  ;;  %v438_v60 = vld [vmem:[%s3516_s1 + $0x10] sm:$0xff]  ;;  %v439_v61 = vld [vmem:[%s3516_s1 + $0x18] sm:$0xff]  ;;  %v436_v63 = vld [vmem:[%s3516_s1] sm:$0xff]  ;;  %s2642_s5 = sld [smem:[#allocation4 + $0x6]]  ;;  %v710_v51 = vstv %s2612_s14 }
  0x4b   : > { %1948 = vmatpush3.bf16.msra.mxu1 %v387_v26  ;;  %v453_v62 = vpack.c.bf16 %v439_v61, %v438_v60  ;;  %v437_v0 = vld [vmem:[%s3516_s1 + $0x8] sm:$0xff]  ;;  %v370_v2 = vld [vmem:[%s3514_s3 + $0x20] sm:$0xff]  ;;  %v368_v6 = vld [vmem:[%s3514_s3 + $0x10] sm:$0xff]  ;;  %s2636_s1 = sld [smem:[#allocation4 + $0x4]]  ;;  %v726_v52 = vstv %s2614_s12 }
  0x4c   : > { %1930 = vmatpush3.bf16.msra.mxu0 %v319_v12  ;;  %1949 = vmatprep.subr.bf16.mxu1 %v3482_v3  ;;  %v452_v1 = vpack.c.bf16 %v437_v0, %v436_v63  ;;  %v371_v4 = vld [vmem:[%s3514_s3 + $0x28] sm:$0xff]  ;;  %v369_v7 = vld [vmem:[%s3514_s3 + $0x18] sm:$0xff]  ;;  %v366_v9 = vld [vmem:[%s3514_s3] sm:$0xff]  ;;  %s2644_s29 = sld [smem:[#allocation4 + $0x86]]  ;;  %v940_v54 = vstv %s2618_s16 }
  0x4d   : > { %1931 = vmatprep.subr.bf16.mxu0 %v3482_v3  ;;  %v384_v5 = vpack.c.bf16 %v371_v4, %v370_v2  ;;  %v383_v8 = vpack.c.bf16 %v369_v7, %v368_v6  ;;  %v367_v10 = vld [vmem:[%s3514_s3 + $0x8] sm:$0xff]  ;;  %s2640_s3 = sld [smem:[#allocation4 + $0x104]]  ;;  %v956_v55 = vstv %s2620_s17  ;;  %v1056_v57 = vstv %s2624_s19 }
  0x4e   : > { %v382_v11 = vpack.c.bf16 %v367_v10, %v366_v9  ;;  %s2646_s25 = sld [smem:[#allocation4 + $0x106]]  ;;  %v1072_v58 = vstv %s2626_s20 }
  0x4f   : > { %1950 = vmatpush3.bf16.msra.mxu1 %v386_v32  ;;  %s2648_s10 = sld [smem:[#allocation4 + $0x7]]  ;;  %v1188_v0 = vstv %s2638_s2 }
  0x50   : > { %1932 = vmatpush3.bf16.msra.mxu0 %v318_v21  ;;  %1951 = vmatprep.subr.bf16.mxu1 %v3482_v3  ;;  %s2650_s23 = sld [smem:[#allocation4 + $0x87]]  ;;  %v1404_v2 = vstv %s2642_s5 }
  0x51   : > { %1933 = vmatprep.subr.bf16.mxu0 %v3482_v3  ;;  %s2652_s9 = sld [smem:[#allocation4 + $0x107]]  ;;  %v1172_v63 = vstv %s2636_s1 }
  0x52   : > { %s2654_s21 = sld [smem:[#allocation4 + $0x9]]  ;;  %v1420_v4 = vstv %s2644_s29 }
  0x53   : > { %1952 = vmatpush3.bf16.msra.mxu1 %v385_v38  ;;  %s2656_s26 = sld [smem:[#allocation4 + $0x89]] }
  0x54   : > { %1934 = vmatpush3.bf16.msra.mxu0 %v317_v27  ;;  %1953 = vmatprep.subr.bf16.mxu1 %v3482_v3  ;;  %3517 = sst [smem:[#allocation20_spill]] %s2646_s25 }
  0x55   : > { %1935 = vmatprep.subr.bf16.mxu0 %v3482_v3  ;;  %3518 = sst [smem:[#allocation21_spill]] %s2648_s10 }
  0x56   : > { %3519 = sst [smem:[#allocation22_spill]] %s2650_s23 }
  0x57   : > { %1954 = vmatpush3.bf16.msra.mxu1 %v384_v5  ;;  %3520 = sst [smem:[#allocation23_spill]] %s2652_s9 }
  0x58   : > { %1936 = vmatpush3.bf16.msra.mxu0 %v316_v33  ;;  %1955 = vmatprep.subr.bf16.mxu1 %v3482_v3  ;;  %3521 = sst [smem:[#allocation24_spill]] %s2654_s21 }
  0x59   : > { %1937 = vmatprep.subr.bf16.mxu0 %v3482_v3  ;;  %3522 = sst [smem:[#allocation25_spill]] %s2656_s26 }
  0x5a   : > { %s2658_s6 = sld [smem:[#allocation4 + $0x109]] }
  0x5b   : > { %1956 = vmatpush3.bf16.msra.mxu1 %v383_v8  ;;  %s2660_s7 = sld [smem:[#allocation4 + $0x8]] }
  0x5c   : > { %1938 = vmatpush3.bf16.msra.mxu0 %v315_v39  ;;  %1957 = vmatprep.subr.bf16.mxu1 %v3482_v3  ;;  %s2662_s24 = sld [smem:[#allocation4 + $0x88]] }
  0x5d   : > { %1963 = vmatprep.subr.bf16.mxu0 %v3482_v3  ;;  %s2664_s22 = sld [smem:[#allocation4 + $0x108]] }
  0x5e   : > { %s2666_s4 = sld [smem:[#allocation4 + $0xa]] }
  0x5f   : > { %1940 = vmatmul.mubr.bf16.vlgmr.msra.gmra.mxu0 %v298_v43  ;;  %1958 = vmatpush3.bf16.msra.mxu1 %v382_v11  ;;  %s2668_s25 = sld [smem:[#allocation4 + $0x8a]] }
  0x60   : > { %1964 = vmatpush3.bf16.msra.mxu0 %v459_v44  ;;  %1979 = vmatprep.mubr.msk.bf16.mxu0 %vm2263_vm0, %v3482_v3  ;;  %3523 = sst [smem:[#allocation26_spill]] %s2658_s6 }
  0x61   : > { %1965 = vmatprep.subr.bf16.mxu0 %v3482_v3  ;;  %1983 = vmatprep.subr.bf16.mxu1 %v3482_v3  ;;  %3524 = sst [smem:[#allocation27_spill]] %s2660_s7 }
  0x62   : > { %1960 = vmatmul.mubr.bf16.vlgmr.msra.gmra.mxu1 %v298_v43  ;;  %3525 = sst [smem:[#allocation28_spill]] %s2662_s24 }
  0x63   : > { %1985 = vmatprep.mubr.msk.bf16.mxu1 %vm2263_vm0, %v3482_v3  ;;  %3526 = sst [smem:[#allocation29_spill]] %s2664_s22 }
  0x64   : > { %1966 = vmatpush3.bf16.msra.mxu0 %v458_v47  ;;  %3527 = sst [smem:[#allocation30_spill]] %s2666_s4 }
  0x65   : > { %1967 = vmatprep.subr.bf16.mxu0 %v3482_v3  ;;  %3528 = sst [smem:[#allocation31_spill]] %s2668_s25 }
  0x66   : > { %s2670_s10 = sld [smem:[#allocation4 + $0x11]] }
  0x67   : > { %s2672_s23 = sld [smem:[#allocation4 + $0x91]] }
  0x68   : > { %1968 = vmatpush3.bf16.msra.mxu0 %v457_v50  ;;  %s2674_s9 = sld [smem:[#allocation4 + $0x111]]  ;;  %v854_v50 = vstv %s2610_s13 }
  0x69   : > { %1969 = vmatprep.subr.bf16.mxu0 %v3482_v3  ;;  %s2676_s21 = sld [smem:[#allocation4 + $0x10]] }
  0x6a   : > { %s2678_s26 = sld [smem:[#allocation4 + $0x90]] }
  0x6b   : > { %s2680_s6 = sld [smem:[#allocation4 + $0x110]] }
  0x6c   : > { %1970 = vmatpush3.bf16.msra.mxu0 %v456_v53  ;;  %3529 = sst [smem:[#allocation32_spill]] %s2670_s10  ;;  %v743_v53 = vstv %s2616_s15 }
  0x6d   : > { %1971 = vmatprep.subr.bf16.mxu0 %v3482_v3  ;;  %3530 = sst [smem:[#allocation33_spill]] %s2672_s23 }
  0x6e   : > { %3531 = sst [smem:[#allocation34_spill]] %s2674_s9 }
  0x6f   : > { %3532 = sst [smem:[#allocation35_spill]] %s2676_s21 }
  0x70   : > { %1972 = vmatpush3.bf16.msra.mxu0 %v455_v56  ;;  %3533 = sst [smem:[#allocation36_spill]] %s2678_s26  ;;  %v973_v56 = vstv %s2622_s18 }
  0x71   : > { %1973 = vmatprep.subr.bf16.mxu0 %v3482_v3  ;;  %3534 = sst [smem:[#allocation37_spill]] %s2680_s6 }
  0x72   : > { %s2682_s7 = sld [smem:[#allocation4 + $0x12]] }
  0x73   : > { %s2684_s24 = sld [smem:[#allocation4 + $0x92]] }
  0x74   : > { %1974 = vmatpush3.bf16.msra.mxu0 %v454_v59  ;;  %s2686_s22 = sld [smem:[#allocation4 + $0x19]] }
  0x75   : > { %1975 = vmatprep.subr.bf16.mxu0 %v3482_v3  ;;  %s2688_s4 = sld [smem:[#allocation4 + $0x99]] }
  0x76   : > { %s2690_s25 = sld [smem:[#allocation4 + $0x119]] }
  0x77   : > { %s2692_s10 = sld [smem:[#allocation4 + $0x18]] }
  0x78   : > { %1976 = vmatpush3.bf16.msra.mxu0 %v453_v62  ;;  %3535 = sst [smem:[#allocation38_spill]] %s2682_s7  ;;  %v1321_v62 = vstv %s2634_s0 }
  0x79   : > { %1977 = vmatprep.subr.bf16.mxu0 %v3482_v3  ;;  %3536 = sst [smem:[#allocation39_spill]] %s2684_s24 }
  0x7a   : > { %3537 = sst [smem:[#allocation40_spill]] %s2686_s22 }
  0x7b   : > { %3538 = sst [smem:[#allocation41_spill]] %s2688_s4 }
  0x7c   : > { %1978 = vmatpush3.bf16.msra.mxu0 %v452_v1  ;;  %3539 = sst [smem:[#allocation42_spill]] %s2690_s25  ;;  %v1205_v1 = vstv %s2640_s3 }
  0x7d   : > { %2007 = vmatprep.subr.bf16.mxu0 %v3482_v3  ;;  %3540 = sst [smem:[#allocation43_spill]] %s2692_s10 }
  0x7e   : > { %s2694_s23 = sld [smem:[#allocation4 + $0x98]] }
  0x7f   : > { %1980 = vmatmul.mubr.bf16.vlgmr.msra.gmra.mxu0 %v298_v43  ;;  %s2696_s9 = sld [smem:[#allocation4 + $0x118]] }
  0x80   : > { %2009 = vmatprep.mubr.msk.bf16.mxu0 %vm2263_vm0, %v3482_v3  ;;  %s2698_s21 = sld [smem:[#allocation4 + $0x1a]] }
  0x81   : > { %s2700_s26 = sld [smem:[#allocation4 + $0x9a]] }
  0x82   : > { %s2702_s6 = sld [smem:[#allocation4 + $0x10a]] }
  0x83   : > { %s2704_s7 = sld [smem:[#allocation4 + $0x112]] }
  0x84   : > { %3541 = sst [smem:[#allocation44_spill]] %s2694_s23 }
  0x85   : > { %3542 = sst [smem:[#allocation45_spill]] %s2696_s9 }
  0x86   : > { %3543 = sst [smem:[#allocation46_spill]] %s2698_s21 }
  0x87   : > { %3544 = sst [smem:[#allocation47_spill]] %s2700_s26 }
  0x88   : > { %3545 = sst [smem:[#allocation48_spill]] %s2702_s6 }
  0x89   : > { %3546 = sst [smem:[#allocation49_spill]] %s2704_s7 }
  0x8a   : > { %s2706_s24 = sld [smem:[#allocation4 + $0x11a]] }
  0x8b   : > { %s2708_s22 = sld [smem:[#allocation4 + $0xb]] }
  0x8c   : > { %s2710_s4 = sld [smem:[#allocation4 + $0x13]] }
  0x8d   : > { %s2712_s25 = sld [smem:[#allocation4 + $0x1b]] }
  0x8e   : > { %s2714_s10 = sld [smem:[#allocation4 + $0x8b]] }
  0x8f   : > { %s2716_s23 = sld [smem:[#allocation4 + $0x93]] }
  0x90   : > { %3547 = sst [smem:[#allocation50_spill]] %s2706_s24 }
  0x91   : > { %3548 = sst [smem:[#allocation51_spill]] %s2708_s22 }
  0x92   : > { %3549 = sst [smem:[#allocation52_spill]] %s2710_s4 }
  0x93   : > { %3550 = sst [smem:[#allocation53_spill]] %s2712_s25 }
  0x94   : > { %3551 = sst [smem:[#allocation54_spill]] %s2714_s10 }
  0x95   : > { %3552 = sst [smem:[#allocation55_spill]] %s2716_s23 }
  0x96   : > { %s2718_s9 = sld [smem:[#allocation4 + $0x9b]] }
  0x97   : > { %s2720_s21 = sld [smem:[#allocation4 + $0x10b]] }
  0x98   : > { %s2722_s26 = sld [smem:[#allocation4 + $0x113]] }
  0x99   : > { %s2724_s6 = sld [smem:[#allocation4 + $0x11b]] }
  0x9a   : > { %s2726_s7 = sld [smem:[#allocation4 + $0xd]] }
  0x9b   : > { %s2728_s24 = sld [smem:[#allocation4 + $0x15]] }
  0x9c   : > { %3553 = sst [smem:[#allocation56_spill]] %s2718_s9 }
  0x9d   : > { %3554 = sst [smem:[#allocation57_spill]] %s2720_s21 }
  0x9e   : > { %3555 = sst [smem:[#allocation58_spill]] %s2722_s26 }
  0x9f   : > { %3556 = sst [smem:[#allocation59_spill]] %s2724_s6 }
  0xa0   : > { %3557 = sst [smem:[#allocation60_spill]] %s2726_s7 }
  0xa1   : > { %3558 = sst [smem:[#allocation61_spill]] %s2728_s24 }
  0xa2   : > { %s2730_s22 = sld [smem:[#allocation4 + $0x1d]] }
  0xa3   : > { %s2732_s25 = sld [smem:[#allocation4 + $0x8d]] }
  0xa4   : > { %s2734_s10 = sld [smem:[#allocation4 + $0x95]] }
  0xa5   : > { %s2736_s9 = sld [smem:[#allocation4 + $0x9d]] }
  0xa6   : > { %s2738_s21 = sld [smem:[#allocation4 + $0x10d]] }
  0xa7   : > { %s2740_s26 = sld [smem:[#allocation4 + $0x115]] }
  0xa8   : > { %3559 = sst [smem:[#allocation62_spill]] %s2730_s22 }
  0xa9   : > { %3560 = sst [smem:[#allocation63_spill]] %s2732_s25 }
  0xaa   : > { %3561 = sst [smem:[#allocation64_spill]] %s2734_s10 }
  0xab   : > { %3562 = sst [smem:[#allocation65_spill]] %s2736_s9 }
  0xac   : > { %s2742_s7 = sld [smem:[#allocation4 + $0x11d]] }
  0xad   : > { %3563 = sst [smem:[#allocation66_spill]] %s2740_s26 }
  0xae   : > { %s2744_s24 = sld [smem:[#allocation4 + $0xc]] }
  0xaf   : > { %s2746_s25 = sld [smem:[#allocation4 + $0x14]] }
  0xb0   : > { %s2749_s9 = sld [smem:[#allocation4 + $0x1c]] }
  0xb1   : > { %s2751_s26 = sld [smem:[#allocation4 + $0x8c]] }
  0xb2   : > { %3564 = sst [smem:[#allocation67_spill]] %s2742_s7 }
  0xb3   : > { %s2754_s7 = sld [smem:[#allocation4 + $0x94]] }
  0xb4   : > { %s3570_s8 = sld [smem:[#allocation20_spill]] }
  0xb5   : > { %3565 = sst [smem:[#allocation68_spill]] %s2746_s25 }
  0xb6   : > { %s2759_s25 = sld [smem:[#allocation4 + $0x9c]] }
  0xb7   : > { %3566 = sst [smem:[#allocation69_spill]] %s2751_s26 }
  0xb8   : > { %s2765_s26 = sld [smem:[#allocation4 + $0x10c]] }
  0xb9   : > { %3567 = sst [smem:[#allocation70_spill]] %s2754_s7 }
  0xba   : > { %s3571_s11 = sld [smem:[#allocation21_spill]]  ;;  %v1437_v5 = vstv %s3570_s8 }
  0xbb   : > { %s3572_s13 = sld [smem:[#allocation22_spill]] }
  0xbc   : > { %3568 = sst [smem:[#allocation71_spill]] %s2759_s25 }
  0xbd   : > { %s2771_s7 = sld [smem:[#allocation4 + $0x114]] }
  0xbe   : > { %3569 = sst [smem:[#allocation72_spill]] %s2765_s26 }
  0xbf   : > { %s3574_s25 = sld [smem:[#allocation24_spill]] }
  0xc0   : > { %s3575_s14 = sld [smem:[#allocation25_spill]]  ;;  %v1520_v6 = vstv %s3571_s11 }
  0xc1   : > { %s3576_s12 = sld [smem:[#allocation26_spill]]  ;;  %v1536_v7 = vstv %s3572_s13 }
  0xc2   : > { %s2777_s16 = sld [smem:[#allocation4 + $0x11c]] }
  0xc3   : > { %3573 = sst [smem:[#allocation20_spill]] %s2771_s7 }
  0xc4   : > { %s3579_s17 = sld [smem:[#allocation27_spill]] }
  0xc5   : > { %s3580_s18 = sld [smem:[#allocation28_spill]]  ;;  %v824_v8 = vstv %s3574_s25 }
  0xc6   : > { %s3581_s19 = sld [smem:[#allocation29_spill]]  ;;  %v840_v9 = vstv %s3575_s14 }
  0xc7   : > { %s3582_s20 = sld [smem:[#allocation30_spill]]  ;;  %v857_v10 = vstv %s3576_s12 }
  0xc8   : > { %3578 = sst [smem:[#allocation21_spill]] %s2777_s16 }
  0xc9   : > { %s2783_s26 = sld [smem:[#allocation4 + $0xe]] }
  0xca   : > { %s3584_s7 = sld [smem:[#allocation32_spill]] }
  0xcb   : > { %s3588_s0 = sld [smem:[#allocation31_spill]] }
  0xcc   : > { %s3589_s1 = sld [smem:[#allocation35_spill]] }
  0xcd   : > { %s3590_s2 = sld [smem:[#allocation36_spill]] }
  0xce   : > { %s3591_s3 = sld [smem:[#allocation37_spill]] }
  0xcf   : > { %3583 = sst [smem:[#allocation22_spill]] %s2783_s26 }
  0xd0   : > { %s2794_s16 = sld [smem:[#allocation4 + $0x1e]] }
  0xd1   : > { %s2801_s5 = sld [smem:[#allocation4 + $0x8e]] }
  0xd2   : > { %s3593_s8 = sld [smem:[#allocation38_spill]] }
  0xd3   : > { %s2807_s11 = sld [smem:[#allocation4 + $0x96]] }
  0xd4   : > { %s3595_s15 = sld [smem:[#allocation39_spill]] }
  0xd5   : > { %s2861_s13 = sld [smem:[#allocation4 + $0xf]] }
  0xd6   : > { %s2897_s14 = sld [smem:[#allocation4 + $0x8f]] }
  0xd7   : > { %s3617_s29 = sld [smem:[#allocation58_spill]] }
  0xd8   : > { %s3668_s23 = sld [smem:[#allocation40_spill]] }
  0xd9   : > { %s3670_s26 = sld [smem:[#allocation41_spill]] }
  0xda   : > { %s3672_s12 = sld [smem:[#allocation42_spill]] }
  0xdb   : > { %3603 = sst [smem:[#allocation77_spill]] %s2861_s13 }
  0xdc   : > { %3614 = sst [smem:[#allocation80_spill]] %s2897_s14 }
  0xdd   : > { %s3619_s13 = sld [smem:[#allocation60_spill]] }
  0xde   : > { %s3621_s14 = sld [smem:[#allocation63_spill]] }
  0xdf   : > { %s3639_s10 = sld [smem:[#allocation80_spill]] }
 0x11f   : > { %v357_v12 = vpop.f32.mrf.mxu0 }
 0x120   : > { %v363_v13 = vpack.c.bf16 %v357_v12, %v357_v12  ;;  %v713_v12 = vstv %s3579_s17  ;;  %s2885_s17 = sld [smem:[#allocation4 + $0x1f]] }
 0x121   : > { %v1941_v14 = vpop.f32.mrf.mxu0 }
 0x122   : > { %365 = vst.msk [vmem:[#allocation2] sm:$0xf] %vm364_vm1, %v363_v13  ;;  %v424_v25 = vpop.f32.mrf.mxu1  ;;  %v729_v13 = vstv %s3580_s18  ;;  %v746_v14 = vstv %s3581_s19  ;;  %s2815_s19 = sld [smem:[#allocation4 + $0x9e]] }
 0x123   : > { %v360_v15 = vpop.f32.mrf.mxu0  ;;  %v430_v26 = vpack.c.bf16 %v424_v25, %v424_v25  ;;  %s3610_s18 = sld [smem:[#allocation51_spill]] }
 0x124   : > { %v1961_v27 = vpop.f32.mrf.mxu1  ;;  %v943_v15 = vstv %s3582_s20  ;;  %s2873_s20 = sld [smem:[#allocation4 + $0x17]] }
 0x125   : > { %v1942_v16 = vpop.f32.mrf.mxu0  ;;  %431 = vst [vmem:[#allocation3] sm:$0xf] %v430_v26 }
 0x126   : > { %v427_v28 = vpop.f32.mrf.mxu1  ;;  %v828_v16 = vstv %s3584_s7  ;;  %s3607_s7 = sld [smem:[#allocation48_spill]] }
 0x127   : > { %3611 = sst [smem:[#allocation79_spill]] %s2885_s17 }
 0x128   : > { %v1962_v29 = vpop.f32.mrf.mxu1  ;;  %s2907_s17 = sld [smem:[#allocation4 + $0x97]] }
 0x129   : > { %v501_v17 = vld [vmem:[#allocation2] sm:$0xf] }
 0x12a   : > { %v508_v18 = vsel %vm503_vm2, %v501_v17, 0  ;;  %v1758_v19 = vcombine.low %v501_v17, %v501_v17  ;;  %3606 = sst [smem:[#allocation78_spill]] %s2873_s20 }
 0x12b   : > { %1984 = vmatpush3.bf16.xpose.msra.mxu1 %v508_v18  ;;  %s3616_s20 = sld [smem:[#allocation57_spill]] }
 0x12c   : > { %606 = vrot.lane.b32.xlu1 %v1758_v19, %s3412_s28  ;;  %556 = vrot.lane.b32.xlu0 %v1758_v19, %s3411_s30  ;;  %v502_v30 = vld [vmem:[#allocation3] sm:$0xf]  ;;  %s3637_s25 = sld [smem:[#allocation78_spill]] }
 0x12d   : > { %1989 = vmatprep.subr.bf16.mxu1 %v3482_v3  ;;  %v2579_v31 = vcombine.low %v502_v30, %v502_v30  ;;  %v776_v32 = vsel %vm774_vm3, %v502_v30, 0 }
 0x12e   : > { %2008 = vmatpush3.bf16.msra.mxu0 %v776_v32  ;;  %v947_v32 = vstv %s3593_s8  ;;  %3618 = sst [smem:[#allocation57_spill]] %s2907_s17 }
 0x12f   : > { %2019 = vmatprep.subr.bf16.mxu0 %v3482_v3  ;;  %s2913_s8 = sld [smem:[#allocation4 + $0x9f]] }
 0x130   : > { %s2919_s17 = sld [smem:[#allocation4 + $0x10f]] }
 0x136   : > { %3625 = sst [smem:[#allocation58_spill]] %s2919_s17 }
 0x137   : > { %s2931_s17 = sld [smem:[#allocation4 + $0x11f]] }
 0x13f   : > { %v494_v20 = vpop.f32.mrf.mxu0 }
 0x140   : > { %v500_v21 = vpack.c.bf16 %v494_v20, %v494_v20 }
 0x141   : > { %v1981_v22 = vpop.f32.mrf.mxu0 }
 0x142   : > { %604 = vrot.lane.b32.xlu1 %v500_v21, %s3412_s28  ;;  %551 = vrot.lane.b32.xlu0 %v500_v21, %s3411_s30  ;;  %v733_v22 = vstv %s3590_s2  ;;  %s3613_s2 = sld [smem:[#allocation54_spill]] }
 0x143   : > { %1986 = vmatmul.mubr.msk.bf16.vlgmr.msra.gmra.mxu1 %vm503_vm2, %v500_v21  ;;  %v497_v23 = vpop.f32.mrf.mxu0 }
 0x144   : > { %1991 = vmatprep.mubr.msk.bf16.mxu1 %vm2263_vm0, %v3482_v3  ;;  %v750_v23 = vstv %s3591_s3  ;;  %s2839_s3 = sld [smem:[#allocation4 + $0x116]] }
 0x145   : > { %v1982_v24 = vpop.f32.mrf.mxu0 }
 0x146   : > { %654 = vrot.lane.b32.xlu1 %v500_v21, %s3413_s27  ;;  %656 = vrot.lane.b32.xlu0 %v1758_v19, %s3413_s27  ;;  %v959_v19 = vstv %s3588_s0  ;;  %v717_v21 = vstv %s3589_s1  ;;  %s3608_s0 = sld [smem:[#allocation49_spill]] }
 0x147   : > { %s3708_s1 = sld [smem:[#allocation21_spill]] }
 0x14a   : > { %884 = vrot.lane.b32.xlu1 %v2579_v31, %s3411_s30  ;;  %1000 = vrot.lane.b32.xlu0 %v2579_v31, %s3412_s28  ;;  %s2628_s30 = sld [smem:[#allocation4 + $0x103]] }
 0x14b   : > { %s2630_s28 = sld [smem:[#allocation4 + $0x5]] }
 0x14c   : > { %3599 = sst [smem:[#allocation75_spill]] %s2839_s3 }
 0x14d   : > { %s3623_s3 = sld [smem:[#allocation66_spill]] }
 0x14e   : > { %1116 = vrot.lane.b32.xlu1 %v2579_v31, %s3413_s27  ;;  %s2632_s27 = sld [smem:[#allocation4 + $0x85]] }
 0x14f   : > { %s3634_s6 = sld [smem:[#allocation75_spill]] }
 0x150   : > { %v1089_v59 = vstv %s2628_s30  ;;  %s2785_s30 = sld [smem:[#allocation4 + $0x16]] }
 0x151   : > { %v1288_v60 = vstv %s2630_s28  ;;  %s3586_s28 = sld [smem:[#allocation33_spill]] }
 0x154   : > { %v1304_v61 = vstv %s2632_s27  ;;  %s3587_s27 = sld [smem:[#allocation34_spill]] }
 0x156   : > { %3585 = sst [smem:[#allocation73_spill]] %s2785_s30 }
 0x157   : > { %v844_v17 = vstv %s3586_s28  ;;  %s2849_s28 = sld [smem:[#allocation4 + $0x11e]] }
 0x158   : > { %s3679_s30 = sld [smem:[#allocation47_spill]] }
 0x15a   : > { %v861_v18 = vstv %s3587_s27  ;;  %s2829_s27 = sld [smem:[#allocation4 + $0x10e]] }
 0x15d   : > { %3601 = sst [smem:[#allocation76_spill]] %s2849_s28 }
 0x15e   : > { %s3635_s22 = sld [smem:[#allocation76_spill]] }
 0x15f   : > { %s3684_s28 = sld [smem:[#allocation85_spill]] }
 0x160   : > { %3597 = sst [smem:[#allocation74_spill]] %s2829_s27 }
 0x161   : > { %s3624_s27 = sld [smem:[#allocation67_spill]] }
 0x19e   : > { %v557_v33 = vpop.permute.xlu0 %556  ;;  %v607_v35 = vpop.permute.xlu1 %606 }
 0x19f   : > { %v562_v34 = vsel %vm503_vm2, %v557_v33, 0  ;;  %v612_v37 = vsel %vm503_vm2, %v607_v35, 0  ;;  %v963_v35 = vstv %s3595_s15  ;;  %v1444_v33 = vstv %s3634_s6  ;;  %s3674_s15 = sld [smem:[#allocation43_spill]] }
 0x1a0   : > { %1990 = vmatpush3.bf16.xpose.msra.mxu1 %v562_v34  ;;  %s3727_s6 = sld [smem:[#allocation23_spill]] }
 0x1a1   : > { %1995 = vmatprep.subr.bf16.mxu1 %v3482_v3 }
 0x1b4   : > { %v552_v36 = vpop.permute.xlu0 %551  ;;  %v605_v39 = vpop.permute.xlu1 %604 }
 0x1b5   : > { %1992 = vmatmul.mubr.msk.bf16.vlgmr.msra.gmra.mxu1 %vm503_vm2, %v552_v36 }
 0x1b6   : > { %1996 = vmatpush3.bf16.xpose.msra.mxu1 %v612_v37  ;;  %1997 = vmatprep.mubr.msk.bf16.mxu1 %vm2263_vm0, %v3482_v3 }
 0x1b7   : > { %2001 = vmatprep.subr.bf16.mxu1 %v3482_v3 }
 0x1b8   : > { %v657_v38 = vpop.permute.xlu0 %656  ;;  %v655_v41 = vpop.permute.xlu1 %654 }
 0x1b9   : > { %v662_v40 = vsel %vm503_vm2, %v657_v38, 0 }
 0x1bc   : > { %v885_v46 = vpop.permute.xlu1 %884 }
 0x1bd   : > { %1998 = vmatmul.mubr.msk.bf16.vlgmr.msra.gmra.mxu1 %vm503_vm2, %v605_v39  ;;  %v890_v47 = vsel %vm774_vm3, %v885_v46, 0 }
 0x1be   : > { %2002 = vmatpush3.bf16.xpose.msra.mxu1 %v662_v40  ;;  %2003 = vmatprep.mubr.msk.bf16.mxu1 %vm2263_vm0, %v3482_v3 }
 0x1bf   : > { %2013 = vmatprep.subr.bf16.mxu1 %v3482_v3 }
 0x1c5   : > { %2004 = vmatmul.mubr.msk.bf16.vlgmr.msra.gmra.mxu1 %vm503_vm2, %v655_v41 }
 0x1c6   : > { %2015 = vmatprep.mubr.msk.bf16.mxu1 %vm2263_vm0, %v3482_v3  ;;  %2014 = vmatpush3.bf16.msra.mxu1 %v890_v47 }
 0x1c7   : > { %2025 = vmatprep.subr.bf16.mxu1 %v3482_v3 }
 0x203   : > { %v2604_v42 = vpop.f32.mrf.mxu1 }
 0x204   : > { %v2810_v20 = vmul.f32 %v821_v48, %v2604_v42  ;;  %v2818_v24 = vmul.f32 %v837_v49, %v2604_v42  ;;  %v2821_v25 = vmul.f32 %v854_v50, %v2604_v42  ;;  %v2824_v26 = vmul.f32 %v710_v51, %v2604_v42 }
 0x205   : > { %v1987_v43 = vpop.f32.mrf.mxu1  ;;  %v2827_v27 = vmul.f32 %v726_v52, %v2604_v42  ;;  %v2833_v29 = vmul.f32 %v743_v53, %v2604_v42  ;;  %v2836_v30 = vmul.f32 %v940_v54, %v2604_v42  ;;  %v2843_v34 = vmul.f32 %v956_v55, %v2604_v42 }
 0x206   : > { %v2847_v36 = vmul.f32 %v973_v56, %v2604_v42  ;;  %v2853_v38 = vmul.f32 %v1056_v57, %v2604_v42  ;;  %v2856_v39 = vmul.f32 %v1072_v58, %v2604_v42  ;;  %v2859_v40 = vmul.f32 %v1089_v59, %v2604_v42 }
 0x207   : > { %v547_v44 = vpop.f32.mrf.mxu1  ;;  %v2865_v43 = vmul.f32 %v1288_v60, %v2604_v42  ;;  %v2877_v47 = vmul.f32 %v1172_v63, %v2604_v42  ;;  %v2880_v48 = vmul.f32 %v1188_v0, %v2604_v42  ;;  %v2883_v49 = vmul.f32 %v1205_v1, %v2604_v42 }
 0x208   : > { %v2868_v44 = vmul.f32 %v1304_v61, %v2604_v42  ;;  %v2889_v51 = vmul.f32 %v1404_v2, %v2604_v42  ;;  %v2892_v52 = vmul.f32 %v1420_v4, %v2604_v42  ;;  %v2895_v53 = vmul.f32 %v1437_v5, %v2604_v42 }
 0x209   : > { %v1988_v45 = vpop.f32.mrf.mxu1  ;;  %v2902_v56 = vmul.f32 %v1520_v6, %v2604_v42  ;;  %v2905_v57 = vmul.f32 %v1536_v7, %v2604_v42  ;;  %v976_v58 = vstv %s3607_s7  ;;  %v980_v59 = vstv %s3608_s0  ;;  %s3626_s0 = sld [smem:[#allocation68_spill]] }
 0x20a   : > { %v2871_v45 = vmul.f32 %v1321_v62, %v2604_v42  ;;  %v1059_v61 = vstv %s3610_s18  ;;  %v1063_v62 = vstv %s2710_s4  ;;  %v1075_v0 = vstv %s3613_s2  ;;  %s2925_s7 = sld [smem:[#allocation4 + $0x117]] }
 0x20b   : > { %v1092_v4 = vstv %s3616_s20  ;;  %v1291_v7 = vstv %s3619_s13  ;;  %s3631_s2 = sld [smem:[#allocation20_spill]]  ;;  %v1307_v63 = vstv %s3621_s14  ;;  %v1324_v6 = vstv %s2738_s21 }
 0x20c   : > { %s3633_s13 = sld [smem:[#allocation74_spill]]  ;;  %v1175_v50 = vstv %s2744_s24 }
 0x20d   : > { %s3636_s14 = sld [smem:[#allocation77_spill]] }
 0x20e   : > { %s3663_s21 = sld [smem:[#allocation55_spill]] }
 0x20f   : > { %s3664_s24 = sld [smem:[#allocation61_spill]] }
 0x210   : > { %s3665_s4 = sld [smem:[#allocation64_spill]] }
 0x211   : > { %s3677_s18 = sld [smem:[#allocation45_spill]] }
 0x212   : > { %s3678_s20 = sld [smem:[#allocation46_spill]] }
 0x213   : > { %v1523_v28 = vstv %s3636_s14  ;;  %s3741_s14 = smov 112  }
 0x275   : > { %v2961_v5 = vpop.f32.mrf.mxu1 }
 0x276   : > { %v825_v37 = vmul.f32 %v824_v8, %v2961_v5  ;;  %v841_v60 = vmul.f32 %v840_v9, %v2961_v5  ;;  %v858_v2 = vmul.f32 %v857_v10, %v2961_v5  ;;  %v714_v54 = vmul.f32 %v713_v12, %v2961_v5 }
 0x277   : > { %v1993_v3 = vpop.f32.mrf.mxu1  ;;  %v730_v1 = vmul.f32 %v729_v13, %v2961_v5  ;;  %v747_v8 = vmul.f32 %v746_v14, %v2961_v5  ;;  %v944_v9 = vmul.f32 %v943_v15, %v2961_v5  ;;  %v960_v10 = vmul.f32 %v959_v19, %v2961_v5 }
 0x278   : > { %v826_v41 = vadd.f32 %v825_v37, %v2810_v20  ;;  %v842_v12 = vadd.f32 %v841_v60, %v2818_v24  ;;  %v859_v3 = vadd.f32 %v858_v2, %v2821_v25  ;;  %v715_v11 = vadd.f32 %v714_v54, %v2824_v26 }
 0x279   : > { %v601_v46 = vpop.f32.mrf.mxu1  ;;  %v731_v13 = vadd.f32 %v730_v1, %v2827_v27  ;;  %v748_v55 = vadd.f32 %v747_v8, %v2833_v29  ;;  %v945_v14 = vadd.f32 %v944_v9, %v2836_v30  ;;  %v961_v15 = vadd.f32 %v960_v10, %v2843_v34 }
 0x27a   : > { %v977_v19 = vmul.f32 %v976_v58, %v2961_v5  ;;  %v1060_v20 = vmul.f32 %v1059_v61, %v2961_v5  ;;  %v1076_v24 = vmul.f32 %v1075_v0, %v2961_v5  ;;  %v1093_v25 = vmul.f32 %v1092_v4, %v2961_v5 }
 0x27b   : > { %v1994_v26 = vpop.f32.mrf.mxu1  ;;  %v1292_v27 = vmul.f32 %v1291_v7, %v2961_v5  ;;  %v1308_v29 = vmul.f32 %v1307_v63, %v2961_v5  ;;  %v1325_v30 = vmul.f32 %v1324_v6, %v2961_v5  ;;  %v1176_v34 = vmul.f32 %v1175_v50, %v2961_v5 }
 0x27c   : > { %v978_v37 = vadd.f32 %v977_v19, %v2847_v36  ;;  %v1061_v46 = vadd.f32 %v1060_v20, %v2853_v38  ;;  %v1077_v54 = vadd.f32 %v1076_v24, %v2856_v39  ;;  %v1094_v58 = vadd.f32 %v1093_v25, %v2859_v40 }
 0x27d   : > { %v3019_v60 = vpop.f32.mrf.mxu1  ;;  %v1293_v61 = vadd.f32 %v1292_v27, %v2865_v43  ;;  %v1309_v63 = vadd.f32 %v1308_v29, %v2868_v44  ;;  %v1326_v0 = vadd.f32 %v1325_v30, %v2871_v45  ;;  %v1177_v50 = vadd.f32 %v1176_v34, %v2877_v47 }
 0x27e   : > { %v829_v36 = vmul.f32 %v828_v16, %v3019_v60  ;;  %v845_v38 = vmul.f32 %v844_v17, %v3019_v60  ;;  %v862_v39 = vmul.f32 %v861_v18, %v3019_v60  ;;  %v718_v40 = vmul.f32 %v717_v21, %v3019_v60 }
 0x27f   : > { %v1999_v43 = vpop.f32.mrf.mxu1  ;;  %v734_v44 = vmul.f32 %v733_v22, %v3019_v60  ;;  %v751_v16 = vmul.f32 %v750_v23, %v3019_v60  ;;  %v948_v17 = vmul.f32 %v947_v32, %v3019_v60  ;;  %v964_v18 = vmul.f32 %v963_v35, %v3019_v60 }
 0x280   : > { %v830_v45 = vadd.f32 %v829_v36, %v826_v41  ;;  %v846_v21 = vadd.f32 %v845_v38, %v842_v12  ;;  %v863_v47 = vadd.f32 %v862_v39, %v859_v3  ;;  %v719_v1 = vadd.f32 %v718_v40, %v715_v11 }
 0x281   : > { %v651_v2 = vpop.f32.mrf.mxu1  ;;  %v735_v22 = vadd.f32 %v734_v44, %v731_v13  ;;  %v752_v4 = vadd.f32 %v751_v16, %v748_v55  ;;  %v949_v6 = vadd.f32 %v948_v17, %v945_v14  ;;  %v965_v7 = vadd.f32 %v964_v18, %v961_v15 }
 0x282   : > { %v981_v23 = vmul.f32 %v980_v59, %v3019_v60  ;;  %v1064_v32 = vmul.f32 %v1063_v62, %v3019_v60  ;;  %v3666_v35 = vstv %s3663_s21  ;;  %v3667_v41 = vstv %s3617_s29  ;;  %s3676_s29 = sld [smem:[#allocation44_spill]] }
 0x283   : > { %v1080_v8 = vmul.f32 %v3666_v35, %v3019_v60  ;;  %v1097_v9 = vmul.f32 %v3667_v41, %v3019_v60  ;;  %v2000_v10 = vpop.f32.mrf.mxu1  ;;  %v3669_v11 = vstv %s3664_s24  ;;  %v3671_v12 = vstv %s3665_s4  ;;  %s3711_s21 = sld [smem:[#allocation22_spill]] }
 0x284   : > { %v1296_v55 = vmul.f32 %v3669_v11, %v3019_v60  ;;  %v1312_v3 = vmul.f32 %v3671_v12, %v3019_v60  ;;  %v3673_v59 = vstv %s3623_s3  ;;  %v3675_v13 = vstv %s3626_s0  ;;  %s3703_s0 = sld [smem:[#allocation71_spill]] }
 0x285   : > { %v1329_v62 = vmul.f32 %v3673_v59, %v3019_v60  ;;  %v1180_v14 = vmul.f32 %v3675_v13, %v3019_v60  ;;  %v982_v15 = vadd.f32 %v981_v23, %v978_v37  ;;  %v1065_v19 = vadd.f32 %v1064_v32, %v1061_v46  ;;  %v3073_v25 = vpop.f32.mrf.mxu1  ;;  %s3704_s3 = sld [smem:[#allocation72_spill]] }
 0x286   : > { %v1081_v20 = vadd.f32 %v1080_v8, %v1077_v54  ;;  %v1098_v24 = vadd.f32 %v1097_v9, %v1094_v58  ;;  %v1297_v26 = vadd.f32 %v1296_v55, %v1293_v61  ;;  %v1313_v27 = vadd.f32 %v1312_v3, %v1309_v63  ;;  %v3094_v61 = vld [vmem:[%s3684_s28] sm:$0xff]  ;;  %v3099_v63 = vld [vmem:[%s3684_s28 + $0x8] sm:$0xff]  ;;  %s3742_s24 = sld [smem:[#allocation13_spill]] }
 0x287   : > { %v3075_v29 = vadd.f32 %v1329_v62, %v1326_v0  ;;  %v3077_v30 = vadd.f32 %v1180_v14, %v1177_v50  ;;  %v3680_v34 = vstv %s3668_s23  ;;  %v3681_v37 = vstv %s3670_s26  ;;  %v2005_v40 = vpop.f32.mrf.mxu1  ;;  %v3104_v0 = vld [vmem:[%s3684_s28 + $0x10] sm:$0xff]  ;;  %s3689_s23 = sld [smem:[#allocation50_spill]] }
 0x288   : > { %v833_v36 = vmul.f32 %v3680_v34, %v3073_v25  ;;  %v849_v46 = vmul.f32 %v3681_v37, %v3073_v25  ;;  %v3682_v54 = vstv %s3672_s12  ;;  %v3683_v38 = vstv %s3674_s15  ;;  %s3690_s26 = sld [smem:[#allocation53_spill]] }
 0x289   : > { %v866_v58 = vmul.f32 %v3682_v54, %v3073_v25  ;;  %v722_v39 = vmul.f32 %v3683_v38, %v3073_v25  ;;  %v3685_v50 = vstv %s3676_s29  ;;  %v3686_v44 = vstv %s3677_s18  ;;  %v701_v9 = vpop.f32.mrf.mxu1  ;;  %s3691_s12 = sld [smem:[#allocation56_spill]] }
 0x28a   : > { %v738_v43 = vmul.f32 %v3685_v50, %v3073_v25  ;;  %v755_v16 = vmul.f32 %v3686_v44, %v3073_v25  ;;  %v3687_v17 = vstv %s3678_s20  ;;  %v3688_v2 = vstv %s3679_s30  ;;  %s3692_s15 = sld [smem:[#allocation59_spill]] }
 0x28b   : > { %v952_v18 = vmul.f32 %v3687_v17, %v3073_v25  ;;  %v968_v23 = vmul.f32 %v3688_v2, %v3073_v25  ;;  %v834_v32 = vadd.f32 %v833_v36, %v830_v45  ;;  %v850_v35 = vadd.f32 %v849_v46, %v846_v21  ;;  %s3693_s29 = sld [smem:[#allocation62_spill]]  ;;  %v2006_v21 = vpop.f32.mrf.mxu1 }
 0x28c   : > { %v867_v8 = vadd.f32 %v866_v58, %v863_v47  ;;  %v723_v41 = vadd.f32 %v722_v39, %v719_v1  ;;  %v739_v10 = vadd.f32 %v738_v43, %v735_v22  ;;  %v756_v11 = vadd.f32 %v755_v16, %v752_v4  ;;  %s3694_s18 = sld [smem:[#allocation65_spill]] }
 0x28d   : > { %v953_v55 = vadd.f32 %v952_v18, %v949_v6  ;;  %v969_v12 = vadd.f32 %v968_v23, %v965_v7  ;;  %v835_v3 = vmul.f32 %v834_v32, %v3094_v61  ;;  %v851_v59 = vmul.f32 %v3099_v63, %v850_v35  ;;  %s3701_s20 = sld [smem:[#allocation69_spill]] }
 0x28e   : > { %v868_v62 = vmul.f32 %v3104_v0, %v867_v8  ;;  %v724_v45 = vmul.f32 %v723_v41, %v3094_v61  ;;  %v740_v47 = vmul.f32 %v3099_v63, %v739_v10  ;;  %v757_v1 = vmul.f32 %v3104_v0, %v756_v11  ;;  %s3702_s30 = sld [smem:[#allocation70_spill]] }
 0x28f   : > { %v954_v22 = vmul.f32 %v953_v55, %v3094_v61  ;;  %v970_v4 = vmul.f32 %v3099_v63, %v969_v12  ;;  %v852_v6 = vadd.f32 %v851_v59, %v835_v3  ;;  %v3695_v7 = vstv %s3689_s23  ;;  %s1869_s23 = sshll.u32 %s3742_s24, 7 }
 0x290   : > { %v985_v13 = vmul.f32 %v3695_v7, %v3073_v25  ;;  %v3696_v14 = vstv %s3690_s26  ;;  %v3697_v36 = vstv %s3691_s12  ;;  %v741_v46 = vadd.f32 %v740_v47, %v724_v45 }
 0x291   : > { %v1068_v34 = vmul.f32 %v3696_v14, %v3073_v25  ;;  %v1084_v37 = vmul.f32 %v3697_v36, %v3073_v25  ;;  %v971_v54 = vadd.f32 %v970_v4, %v954_v22  ;;  %v3698_v58 = vstv %s3692_s15 }
 0x292   : > { %v1101_v38 = vmul.f32 %v3698_v58, %v3073_v25  ;;  %v3699_v39 = vstv %s3693_s29  ;;  %v3141_v50 = vadd.f32 %v868_v62, %v852_v6  ;;  %v986_v43 = vadd.f32 %v985_v13, %v982_v15  ;;  %s3744_s29 = sld [smem:[#allocation87_spill]] }
 0x293   : > { %v1300_v40 = vmul.f32 %v3699_v39, %v3073_v25  ;;  %v1069_v44 = vadd.f32 %v1068_v34, %v1065_v19  ;;  %v1085_v16 = vadd.f32 %v1084_v37, %v1081_v20  ;;  %v3143_v17 = vadd.f32 %v757_v1, %v741_v46 }
 0x294   : > { %v1102_v18 = vadd.f32 %v1101_v38, %v1098_v24  ;;  %v3700_v23 = vstv %s3694_s18  ;;  %v870_v35 = vsel %vm759_vm4, %v3141_v50, -inf  ;;  %v987_v8 = vmul.f32 %v3104_v0, %v986_v43 }
 0x295   : > { %v1301_v2 = vadd.f32 %v1300_v40, %v1297_v26  ;;  %v1316_v32 = vmul.f32 %v3700_v23, %v3073_v25  ;;  %v1070_v15 = vmul.f32 %v1069_v44, %v3094_v61  ;;  %v1086_v19 = vmul.f32 %v3099_v63, %v1085_v16  ;;  %871 = vmax.xlane.f32.xlu1 %v870_v35 }
 0x296   : > { %v760_v20 = vsel %vm759_vm4, %v3143_v17, -inf  ;;  %v1103_v24 = vmul.f32 %v3104_v0, %v1102_v18  ;;  %v3157_v9 = vadd.f32 %v987_v8, %v971_v54  ;;  %v3705_v11 = vstv %s3624_s27  ;;  %s3712_s27 = sld [smem:[#allocation73_spill]] }
 0x297   : > { %v1302_v26 = vmul.f32 %v1301_v2, %v3094_v61  ;;  %v1317_v41 = vadd.f32 %v1316_v32, %v1313_v27  ;;  %761 = vmax.xlane.f32.xlu0 %v760_v20  ;;  %v1087_v10 = vadd.f32 %v1086_v19, %v1070_v15  ;;  %v1333_v55 = vmul.f32 %v3705_v11, %v3073_v25 }
 0x298   : > { %v3706_v12 = vstv %s2749_s9  ;;  %v3707_v62 = vstv %s3701_s20  ;;  %v3709_v27 = vstv %s3702_s30  ;;  %v3710_v47 = vstv %s3703_s0  ;;  %s3722_s9 = sld [smem:[#allocation79_spill]]  ;;  %s3361_s18 = scalar_lea.hbm %s3744_s29, %s1869_s23 }
 0x299   : > { %v1184_v3 = vmul.f32 %v3706_v12, %v3073_v25  ;;  %v1318_v59 = vmul.f32 %v3099_v63, %v1317_v41  ;;  %v1192_v45 = vmul.f32 %v3707_v62, %v2961_v5  ;;  %v1196_v21 = vmul.f32 %v3709_v27, %v3019_v60  ;;  %s2271_s0 = smov [#allocation7]  }
 0x29a   : > { %v1200_v1 = vmul.f32 %v3710_v47, %v3073_v25  ;;  %v989_v22 = vsel %vm759_vm4, %v3157_v9, -inf  ;;  %v3177_v4 = vadd.f32 %v1103_v24, %v1087_v10  ;;  %v1334_v6 = vadd.f32 %v1333_v55, %v3075_v29 }
 0x29b   : > { %v1185_v7 = vadd.f32 %v1184_v3, %v3077_v30  ;;  %v1319_v13 = vadd.f32 %v1318_v59, %v1302_v26  ;;  %v1193_v14 = vadd.f32 %v1192_v45, %v2880_v48  ;;  %v3713_v34 = vstv %s3704_s3  ;;  %990 = vmax.xlane.f32.xlu0 %v989_v22  ;;  %s2183_s3 = sshll.u32 %s2271_s0, 4  ;;  %s2184_s3 = int_to_ptr.vmem [resolvable:$false] %s2183_s3 }
 0x29c   : > { %v1209_v36 = vmul.f32 %v3713_v34, %v2961_v5  ;;  %v3714_v37 = vstv %s3631_s2  ;;  %v1105_v54 = vsel %vm759_vm4, %v3177_v4, -inf  ;;  %v1335_v29 = vmul.f32 %v3104_v0, %v1334_v6 }
 0x29d   : > { %v1213_v46 = vmul.f32 %v3714_v37, %v3019_v60  ;;  %v1186_v30 = vmul.f32 %v1185_v7, %v3094_v61  ;;  %v3715_v58 = vstv %s3708_s1  ;;  %v1197_v48 = vadd.f32 %v1196_v21, %v1193_v14  ;;  %s2185_s1 = scalar_lea.vmem %s2184_s3, 256 }
 0x29e   : > { %v1217_v38 = vmul.f32 %v3715_v58, %v3073_v25  ;;  %v1210_v39 = vadd.f32 %v1209_v36, %v2883_v49  ;;  %v3716_v40 = vstv %s3711_s21  ;;  %v3717_v44 = vstv %s3712_s27 }
 0x29f   : > { %v1408_v43 = vmul.f32 %v3716_v40, %v2961_v5  ;;  %v1412_v16 = vmul.f32 %v3717_v44, %v3019_v60  ;;  %v3202_v18 = vadd.f32 %v1335_v29, %v1319_v13  ;;  %v3718_v2 = vstv %s2794_s16  ;;  %1106 = vmax.xlane.f32.xlu0 %v1105_v54  ;;  %s3725_s16 = sld [smem:[#allocation57_spill]] }
 0x2a0   : > { %v1416_v23 = vmul.f32 %v3718_v2, %v3073_v25  ;;  %v3719_v32 = vstv %s2801_s5  ;;  %v3720_v8 = vstv %s2807_s11  ;;  %v1201_v49 = vadd.f32 %v1200_v1, %v1197_v48  ;;  %s3739_s11 = smov 80  }
 0x2a1   : > { %v1424_v35 = vmul.f32 %v3719_v32, %v2961_v5  ;;  %v1428_v15 = vmul.f32 %v3720_v8, %v3019_v60  ;;  %v1214_v19 = vadd.f32 %v1213_v46, %v1210_v39  ;;  %v1409_v20 = vadd.f32 %v1408_v43, %v2889_v51 }
 0x2a2   : > { %v3721_v24 = vstv %s2815_s19  ;;  %v1337_v41 = vsel %vm759_vm4, %v3202_v18, -inf  ;;  %v3723_v11 = vstv %s3633_s13  ;;  %v1445_v12 = vmul.f32 %v1444_v33, %v3019_v60  ;;  %s3738_s19 = sld [smem:[#allocation11_spill]]  ;;  %s3740_s13 = smov 96  }
 0x2a3   : > { %v1432_v26 = vmul.f32 %v3721_v24, %v3073_v25  ;;  %v1425_v10 = vadd.f32 %v1424_v35, %v2892_v52  ;;  %v1441_v55 = vmul.f32 %v3723_v11, %v2961_v5  ;;  %v1202_v3 = vmul.f32 %v3099_v63, %v1201_v49  ;;  %1338 = vmax.xlane.f32.xlu0 %v1337_v41 }
 0x2a4   : > { %v1218_v51 = vadd.f32 %v1217_v38, %v1214_v19  ;;  %v1413_v59 = vadd.f32 %v1412_v16, %v1409_v20  ;;  %v3724_v62 = vstv %s3635_s22  ;;  %v1524_v52 = vmul.f32 %v1523_v28, %v2961_v5  ;;  %s3729_s22 = sld [smem:[#allocation58_spill]] }
 0x2a5   : > { %v1449_v45 = vmul.f32 %v3724_v62, %v3073_v25  ;;  %v1429_v27 = vadd.f32 %v1428_v15, %v1425_v10  ;;  %v1442_v21 = vadd.f32 %v1441_v55, %v2895_v53  ;;  %v3726_v47 = vstv %s3637_s25  ;;  %s2267_s25 = smov 64   ;;  %v1001_v55 = vpop.permute.xlu0 %1000 }
 0x2a6   : > { %v1528_v1 = vmul.f32 %v3726_v47, %v3019_v60  ;;  %v1203_v33 = vadd.f32 %v1202_v3, %v1186_v30  ;;  %v1219_v22 = vmul.f32 %v3104_v0, %v1218_v51  ;;  %v1417_v6 = vadd.f32 %v1416_v23, %v1413_v59  ;;  %1232 = vrot.lane.b32.xlu1 %v2579_v31, %s2267_s25 }
 0x2a7   : > { %v3728_v7 = vstv %s3722_s9  ;;  %v1433_v14 = vadd.f32 %v1432_v26, %v1429_v27  ;;  %v1446_v34 = vadd.f32 %v1445_v12, %v1442_v21  ;;  %v1525_v53 = vadd.f32 %v1524_v52, %v2902_v56 }
 0x2a8   : > { %v1532_v13 = vmul.f32 %v3728_v7, %v3073_v25  ;;  %v3730_v28 = vstv %s3639_s10  ;;  %v3245_v37 = vadd.f32 %v1219_v22, %v1203_v33  ;;  %v1418_v46 = vmul.f32 %v1417_v6, %v3094_v61  ;;  %s2269_s10 = smov 32   ;;  %s281_s2 = sand.u32 1, %s3738_s19  }
 0x2a9   : > { %v1540_v36 = vmul.f32 %v3730_v28, %v2961_v5  ;;  %v3731_v54 = vstv %s3725_s16  ;;  %v3732_v30 = vstv %s2913_s8  ;;  %v1434_v38 = vmul.f32 %v3099_v63, %v1433_v14  ;;  %s1755_s5 = sshll.u32 %s281_s2, 3  ;;  %s1636_s20 = scalar_lea.sflag [#allocation5], %s281_s2 }
 0x2aa   : > { %v1544_v29 = vmul.f32 %v3731_v54, %v3019_v60  ;;  %v1548_v58 = vmul.f32 %v3732_v30, %v3073_v25  ;;  %v1450_v48 = vadd.f32 %v1449_v45, %v1446_v34  ;;  %v1529_v39 = vadd.f32 %v1528_v1, %v1525_v53  ;;  %s3340_s8 = scalar_lea.vmem [#allocation7], %s1755_s5 }
 0x2ab   : > { %v1541_v56 = vadd.f32 %v1540_v36, %v2905_v57  ;;  %v3733_v40 = vstv %s3727_s6  ;;  %v3734_v44 = vstv %s3729_s22  ;;  %v3735_v2 = vstv %s2925_s7  ;;  %s2268_s7 = smov 48   ;;  %s1650_s26 = sshll.u32 %s3340_s8, 4  ;;  %s1651_s26 = int_to_ptr.vmem [resolvable:$true] %s1650_s26 }
 0x2ac   : > { %v1554_v43 = vmul.f32 %v3733_v40, %v2604_v42  ;;  %v1557_v16 = vmul.f32 %v3734_v44, %v2961_v5  ;;  %v1561_v23 = vmul.f32 %v3735_v2, %v3019_v60  ;;  %v1435_v32 = vadd.f32 %v1434_v38, %v1418_v46  ;;  %s2179_s30 = scalar_lea.vmem %s1651_s26, 128  ;;  %p2186_p0 = scmp.lt.s32.totalorder %s1651_s26, %s2184_s3 }
 0x2ad   : > { %v1451_v35 = vmul.f32 %v3104_v0, %v1450_v48  ;;  %v1533_v8 = vadd.f32 %v1532_v13, %v1529_v39  ;;  %v1545_v15 = vadd.f32 %v1544_v29, %v1541_v56  ;;  %v3736_v57 = vstv %s2931_s17  ;;  %s2270_s17 = smov 16   ;;  %p2180_p11 = scmp.ne.s32.totalorder %s1651_s26, %s2179_s30 }
 0x2ae   : > { %v1558_v49 = vadd.f32 %v1557_v16, %v1554_v43  ;;  %v1565_v19 = vmul.f32 %v3736_v57, %v3073_v25  ;;  %v1221_v25 = vsel %vm759_vm4, %v3245_v37, -inf  ;;  %v3737_v53 = vmov 0.0   ;;  %p2187_p1 = scmp.lt.s32.totalorder %s2185_s1, %s2179_s30 }
 0x2af   : > { %v3271_v42 = vadd.f32 %v1451_v35, %v1435_v32  ;;  %v1534_v5 = vmul.f32 %v1533_v8, %v3094_v61  ;;  %v1549_v20 = vadd.f32 %v1548_v58, %v1545_v15  ;;  %p2181_p12 = pnand %p2180_p11, %p2347_p4 }
 0x2b0   : > { %v1562_v24 = vadd.f32 %v1561_v23, %v1558_v49  ;;  %p2188_p2 = por %p2187_p1, %p2186_p0 }
 0x2b1   : > { %v1550_v60 = vmul.f32 %v3099_v63, %v1549_v20  ;;  %v1453_v61 = vsel %vm759_vm4, %v3271_v42, -inf  ;;  %p2182_p13 = pneg %p2181_p12 }
 0x2b2   : > { %v1566_v26 = vadd.f32 %v1565_v19, %v1562_v24 }
 0x2b3   : > { %v1551_v41 = vadd.f32 %v1550_v60, %v1534_v5  ;;  %p2189_p3 = pnand %p2188_p2, %p2182_p13 }
 0x2b4   : > { %v1567_v10 = vmul.f32 %v3104_v0, %v1566_v26  ;;  %v1117_v0 = vpop.permute.xlu1 %1116 }
 0x2b5   : > { %v1122_v34 = vsel %vm774_vm3, %v1117_v0, 0 }
 0x2b6   : > { %v3276_v11 = vadd.f32 %v1567_v10, %v1551_v41 }
 0x2b8   : > { %v1569_v63 = vsel %vm759_vm4, %v3276_v11, -inf }
 0x2b9   : > { %1348 = vrot.lane.b32.xlu0 %v2579_v31, %s2268_s7 }
 0x2ca   : > { %1222 = vmax.xlane.f32.xlu1 %v1221_v25 }
 0x2ce   : > { %1454 = vmax.xlane.f32.xlu1 %v1453_v61 }
 0x2d8   : > { %1570 = vmax.xlane.f32.xlu0 %v1569_v63 }
 0x2df   : > { %1464 = vrot.lane.b32.xlu1 %v2579_v31, %s2269_s10 }
 0x2ee   : > { %1580 = vrot.lane.b32.xlu0 %v2579_v31, %s2270_s17 }
 0x31e   : > { %v872_v12 = vpop.xlane.xlu1 %871 }
 0x31f   : > { %v873_v3 = vsub.f32 %v3141_v50, %v872_v12 }
 0x320   : > { %v762_v51 = vpop.xlane.xlu0 %761 }
 0x321   : > { %v763_v59 = vsub.f32 %v3143_v17, %v762_v51  ;;  %v874_v62 = vmul.f32 1.442695, %v873_v3 }
 0x322   : > { %v1233_v46 = vpop.permute.xlu1 %1232 }
 0x323   : > { %v764_v45 = vmul.f32 1.442695, %v763_v59  ;;  %2132 = vpow2.f32 %v874_v62  ;;  %v1238_v38 = vsel %vm774_vm3, %v1233_v46, 0 }
 0x324   : > { %v991_v27 = vpop.xlane.xlu0 %990 }
 0x325   : > { %2134 = vpow2.f32 %v764_v45  ;;  %v992_v21 = vsub.f32 %v3157_v9, %v991_v27 }
 0x327   : > { %v993_v52 = vmul.f32 1.442695, %v992_v21 }
 0x328   : > { %v1107_v47 = vpop.xlane.xlu0 %1106 }
 0x329   : > { %2136 = vpow2.f32 %v993_v52  ;;  %v1108_v31 = vsub.f32 %v3177_v4, %v1107_v47  ;;  %v1006_v4 = vsel %vm774_vm3, %v1001_v55, 0 }
 0x32b   : > { %v1109_v1 = vmul.f32 1.442695, %v1108_v31 }
 0x32c   : > { %v1339_v33 = vpop.xlane.xlu0 %1338 }
 0x32d   : > { %2138 = vpow2.f32 %v1109_v1  ;;  %v1340_v50 = vsub.f32 %v3202_v18, %v1339_v33 }
 0x32f   : > { %v1341_v22 = vmul.f32 1.442695, %v1340_v50 }
 0x330   : > { %v2133_v6 = vpop.eup %2132  ;;  %v1349_v54 = vpop.permute.xlu0 %1348 }
 0x331   : > { %2140 = vpow2.f32 %v1341_v22  ;;  %v876_v7 = vsel %vm759_vm4, %v2133_v6, 0.0  ;;  %v880_v13 = vpack.c.bf16 %v2133_v6, %v2133_v6  ;;  %v1354_v48 = vsel %vm774_vm3, %v1349_v54, 0 }
 0x332   : > { %v2135_v17 = vpop.eup %2134  ;;  %877 = vadd.xlane.f32.xlu0 %v876_v7 }
 0x333   : > { %v766_v9 = vsel %vm759_vm4, %v2135_v17, 0.0  ;;  %v770_v14 = vpack.c.bf16 %v2135_v17, %v2135_v17  ;;  %2016 = vmatmul.mubr.msk.bf16.vlgmr.msra.gmra.mxu1 %vm759_vm4, %v880_v13 }
 0x334   : > { %767 = vadd.xlane.f32.xlu1 %v766_v9  ;;  %2026 = vmatpush3.bf16.msra.mxu1 %v1122_v34 }
 0x335   : > { %2010 = vmatmul.mubr.msk.bf16.vlgmr.msra.gmra.mxu0 %vm759_vm4, %v770_v14  ;;  %2027 = vmatprep.mubr.msk.bf16.mxu1 %vm2263_vm0, %v3737_v53 }
 0x336   : > { %v2137_v18 = vpop.eup %2136  ;;  %2020 = vmatpush3.bf16.msra.mxu0 %v1006_v4  ;;  %2021 = vmatprep.mubr.msk.bf16.mxu0 %vm2263_vm0, %v3737_v53 }
 0x337   : > { %v995_v28 = vsel %vm759_vm4, %v2137_v18, 0.0  ;;  %2031 = vmatprep.subr.bf16.mxu0 %v3737_v53  ;;  %2037 = vmatprep.subr.bf16.mxu1 %v3737_v53  ;;  %v999_v30 = vpack.c.bf16 %v2137_v18, %v2137_v18 }
 0x338   : > { %996 = vadd.xlane.f32.xlu0 %v995_v28 }
 0x33a   : > { %v2139_v36 = vpop.eup %2138 }
 0x33b   : > { %v1111_v29 = vsel %vm759_vm4, %v2139_v36, 0.0  ;;  %v1115_v58 = vpack.c.bf16 %v2139_v36, %v2139_v36 }
 0x33c   : > { %1112 = vadd.xlane.f32.xlu1 %v1111_v29 }
 0x33d   : > { %2022 = vmatmul.mubr.msk.bf16.vlgmr.msra.gmra.mxu0 %vm759_vm4, %v999_v30  ;;  %2028 = vmatmul.mubr.msk.bf16.vlgmr.msra.gmra.mxu1 %vm759_vm4, %v1115_v58 }
 0x33e   : > { %v2141_v39 = vpop.eup %2140  ;;  %2032 = vmatpush3.bf16.msra.mxu0 %v1238_v38  ;;  %2038 = vmatpush3.bf16.msra.mxu1 %v1354_v48 }
 0x33f   : > { %v1343_v56 = vsel %vm759_vm4, %v2141_v39, 0.0  ;;  %2039 = vmatprep.mubr.msk.bf16.mxu1 %vm2263_vm0, %v3737_v53  ;;  %2049 = vmatprep.subr.bf16.mxu1 %v3737_v53  ;;  %v1347_v40 = vpack.c.bf16 %v2141_v39, %v2141_v39 }
 0x340   : > { %1344 = vadd.xlane.f32.xlu1 %v1343_v56  ;;  %2033 = vmatprep.mubr.msk.bf16.mxu0 %vm2263_vm0, %v3737_v53 }
 0x341   : > { %2043 = vmatprep.subr.bf16.mxu0 %v3737_v53 }
 0x345   : > { %2040 = vmatmul.mubr.msk.bf16.vlgmr.msra.gmra.mxu1 %vm759_vm4, %v1347_v40 }
 0x346   : > { %2051 = vmatprep.mubr.msk.bf16.mxu1 %vm2263_vm0, %v3737_v53 }
 0x353   : > { %v1223_v43 = vpop.xlane.xlu1 %1222 }
 0x354   : > { %v1224_v44 = vsub.f32 %v3245_v37, %v1223_v43 }
 0x356   : > { %v1225_v16 = vmul.f32 1.442695, %v1224_v44 }
 0x357   : > { %v1455_v2 = vpop.xlane.xlu1 %1454 }
 0x358   : > { %2142 = vpow2.f32 %v1225_v16  ;;  %v1456_v23 = vsub.f32 %v3271_v42, %v1455_v2 }
 0x35a   : > { %v1457_v32 = vmul.f32 1.442695, %v1456_v23 }
 0x35b   : > { %v1465_v19 = vpop.permute.xlu1 %1464 }
 0x35c   : > { %2144 = vpow2.f32 %v1457_v32  ;;  %v1470_v24 = vsel %vm774_vm3, %v1465_v19, 0 }
 0x361   : > { %v1571_v35 = vpop.xlane.xlu0 %1570 }
 0x362   : > { %v1572_v8 = vsub.f32 %v3276_v11, %v1571_v35 }
 0x364   : > { %v1573_v15 = vmul.f32 1.442695, %v1572_v8 }
 0x365   : > { %v1581_v49 = vpop.permute.xlu0 %1580  ;;  %v2143_v57 = vpop.eup %2142 }
 0x366   : > { %2146 = vpow2.f32 %v1573_v15  ;;  %v1586_v5 = vsel %vm774_vm3, %v1581_v49, 0  ;;  %v1227_v37 = vsel %vm759_vm4, %v2143_v57, 0.0  ;;  %v1231_v20 = vpack.c.bf16 %v2143_v57, %v2143_v57 }
 0x367   : > { %2050 = vmatpush3.bf16.msra.mxu1 %v1586_v5  ;;  %1228 = vadd.xlane.f32.xlu0 %v1227_v37 }
 0x368   : > { %2034 = vmatmul.mubr.msk.bf16.vlgmr.msra.gmra.mxu0 %vm759_vm4, %v1231_v20 }
 0x369   : > { %v2145_v42 = vpop.eup %2144  ;;  %2044 = vmatpush3.bf16.msra.mxu0 %v1470_v24  ;;  %2045 = vmatprep.mubr.msk.bf16.mxu0 %vm2263_vm0, %v3737_v53 }
 0x36a   : > { %v1459_v60 = vsel %vm759_vm4, %v2145_v42, 0.0  ;;  %v1463_v26 = vpack.c.bf16 %v2145_v42, %v2145_v42 }
 0x36b   : > { %1460 = vadd.xlane.f32.xlu0 %v1459_v60 }
 0x370   : > { %2046 = vmatmul.mubr.msk.bf16.vlgmr.msra.gmra.mxu0 %vm759_vm4, %v1463_v26 }
 0x373   : > { %v2147_v41 = vpop.eup %2146 }
 0x374   : > { %v1575_v10 = vsel %vm759_vm4, %v2147_v41, 0.0  ;;  %v1579_v11 = vpack.c.bf16 %v2147_v41, %v2147_v41 }
 0x375   : > { %1576 = vadd.xlane.f32.xlu1 %v1575_v10 }
 0x376   : > { %2052 = vmatmul.mubr.msk.bf16.vlgmr.msra.gmra.mxu1 %vm759_vm4, %v1579_v11 }
 0x3bb   : > { %v878_v25 = vpop.xlane.xlu0 %877 }
 0x3bc   : > { %2148 = vrcp.f32 %v878_v25 }
 0x3bd   : > { %v768_v61 = vpop.xlane.xlu1 %767 }
 0x3be   : > { %2150 = vrcp.f32 %v768_v61 }
 0x3c1   : > { %v997_v63 = vpop.xlane.xlu0 %996 }
 0x3c2   : > { %2152 = vrcp.f32 %v997_v63 }
 0x3c5   : > { %v1113_v0 = vpop.xlane.xlu1 %1112 }
 0x3c6   : > { %2154 = vrcp.f32 %v1113_v0 }
 0x3c9   : > { %v2149_v55 = vpop.eup %2148  ;;  %v1345_v51 = vpop.xlane.xlu1 %1344 }
 0x3ca   : > { %2156 = vrcp.f32 %v1345_v51 }
 0x3cb   : > { %v2151_v3 = vpop.eup %2150 }
 0x3cf   : > { %v2153_v33 = vpop.eup %2152 }
 0x3d3   : > { %v2155_v13 = vpop.eup %2154 }
 0x3d7   : > { %v2157_v53 = vpop.eup %2156 }
 0x3f0   : > { %v1229_v30 = vpop.xlane.xlu0 %1228 }
 0x3f1   : > { %2158 = vrcp.f32 %v1229_v30 }
 0x3f3   : > { %v926_v12 = vpop.f32.mrf.mxu1 }
 0x3f4   : > { %v932_v62 = vmul.f32 %v2149_v55, %v926_v12  ;;  %v1461_v58 = vpop.xlane.xlu0 %1460 }
 0x3f5   : > { %v812_v59 = vpop.f32.mrf.mxu0  ;;  %v2017_v27 = vpop.f32.mrf.mxu1  ;;  %2160 = vrcp.f32 %v1461_v58 }
 0x3f6   : > { %v818_v45 = vmul.f32 %v2151_v3, %v812_v59  ;;  %934 = vrot.lane.b32.xlu0 %v932_v62, %s2270_s17 }
 0x3f7   : > { %v2011_v21 = vpop.f32.mrf.mxu0  ;;  %v929_v52 = vpop.f32.mrf.mxu1 }
 0x3f8   : > { %819 = vst.msk [vmem:[%s3340_s8] sm:$0xff] %vm503_vm2, %v818_v45 }
 0x3f9   : > { %v815_v47 = vpop.f32.mrf.mxu0  ;;  %v2018_v31 = vpop.f32.mrf.mxu1 }
 0x3fb   : > { %v2012_v1 = vpop.f32.mrf.mxu0 }
 0x3fd   : > { %v1042_v50 = vpop.f32.mrf.mxu0  ;;  %v1158_v22 = vpop.f32.mrf.mxu1 }
 0x3fe   : > { %v1048_v6 = vmul.f32 %v2153_v33, %v1042_v50  ;;  %v1164_v34 = vmul.f32 %v2155_v13, %v1158_v22  ;;  %v1577_v38 = vpop.xlane.xlu1 %1576  ;;  %v2159_v48 = vpop.eup %2158 }
 0x3ff   : > { %v2023_v17 = vpop.f32.mrf.mxu0  ;;  %v2029_v7 = vpop.f32.mrf.mxu1  ;;  %2162 = vrcp.f32 %v1577_v38 }
 0x400   : > { %1050 = vrot.lane.b32.xlu1 %v1048_v6, %s2269_s10 }
 0x401   : > { %v1045_v9 = vpop.f32.mrf.mxu0  ;;  %v1161_v14 = vpop.f32.mrf.mxu1 }
 0x402   : > { %v2161_v16 = vpop.eup %2160 }
 0x403   : > { %v2024_v4 = vpop.f32.mrf.mxu0  ;;  %v2030_v18 = vpop.f32.mrf.mxu1 }
 0x404   : > { %1166 = vrot.lane.b32.xlu1 %v1164_v34, %s2268_s7 }
 0x405   : > { %v1390_v28 = vpop.f32.mrf.mxu1 }
 0x406   : > { %v1396_v36 = vmul.f32 %v2157_v53, %v1390_v28 }
 0x407   : > { %v2041_v46 = vpop.f32.mrf.mxu1 }
 0x408   : > { %1398 = vrot.lane.b32.xlu1 %v1396_v36, %s3739_s11 }
 0x409   : > { %v1393_v54 = vpop.f32.mrf.mxu1 }
 0x40b   : > { %v2042_v29 = vpop.f32.mrf.mxu1 }
 0x40c   : > { %v2163_v8 = vpop.eup %2162 }
 0x428   : > { %v1274_v39 = vpop.f32.mrf.mxu0 }
 0x429   : > { %v1280_v56 = vmul.f32 %v2159_v48, %v1274_v39 }
 0x42a   : > { %v2035_v40 = vpop.f32.mrf.mxu0 }
 0x42b   : > { %1282 = vrot.lane.b32.xlu0 %v1280_v56, %s2267_s25 }
 0x42c   : > { %v1277_v43 = vpop.f32.mrf.mxu0 }
 0x42e   : > { %v2036_v44 = vpop.f32.mrf.mxu0 }
 0x430   : > { %v1506_v2 = vpop.f32.mrf.mxu0 }
 0x431   : > { %v1512_v23 = vmul.f32 %v2161_v16, %v1506_v2 }
 0x432   : > { %v2047_v32 = vpop.f32.mrf.mxu0 }
 0x433   : > { %1514 = vrot.lane.b32.xlu0 %v1512_v23, %s3740_s13 }
 0x434   : > { %v1509_v35 = vpop.f32.mrf.mxu0 }
 0x436   : > { %v1622_v15 = vpop.f32.mrf.mxu1  ;;  %v2048_v57 = vpop.f32.mrf.mxu0 }
 0x437   : > { %v1628_v49 = vmul.f32 %v2163_v8, %v1622_v15 }
 0x438   : > { %v2053_v19 = vpop.f32.mrf.mxu1 }
 0x439   : > { %1630 = vrot.lane.b32.xlu1 %v1628_v49, %s3741_s14 }
 0x43a   : > { %v1625_v5 = vpop.f32.mrf.mxu1 }
 0x43c   : > { %v2054_v37 = vpop.f32.mrf.mxu1 }
 0x468   : > { %v935_v20 = vpop.permute.xlu0 %934 }
 0x469   : > { %938 = vst.msk [vmem:[%s3340_s8] sm:$0xff] %vm937_vm5, %v935_v20 }
 0x472   : > { %v1051_v24 = vpop.permute.xlu1 %1050 }
 0x473   : > { %1054 = vst.msk [vmem:[%s3340_s8] sm:$0xff] %vm1053_vm6, %v1051_v24 }
 0x476   : > { %v1167_v42 = vpop.permute.xlu1 %1166 }
 0x477   : > { %1170 = vst.msk [vmem:[%s3340_s8] sm:$0xff] %vm1169_vm7, %v1167_v42 }
 0x47a   : > { %v1399_v26 = vpop.permute.xlu1 %1398 }
 0x49d   : > { %v1283_v60 = vpop.permute.xlu0 %1282 }
 0x49e   : > { %1286 = vst.msk [vmem:[%s3340_s8] sm:$0xff] %vm1285_vm8, %v1283_v60 }
 0x49f   : > { %1402 = vst.msk [vmem:[%s3340_s8] sm:$0xff] %vm1401_vm9, %v1399_v26 }
 0x4a5   : > { %v1515_v41 = vpop.permute.xlu0 %1514 }
 0x4a6   : > { %1518 = vst.msk [vmem:[%s3340_s8] sm:$0xff] %vm1517_vm10, %v1515_v41 }
 0x4ab   : > { %v1631_v10 = vpop.permute.xlu1 %1630 }
 0x4ac   : > { %1634 = vst.msk [vmem:[%s3340_s8] sm:$0xff] %vm1633_vm11, %v1631_v10 }
 0x4ad   : > { %2192 = shalt.err (!%p2189_p3)
}
 0x4ae   : > { %s2193_s21 = scalar_lea.hbm %s3361_s18, 128  ;;  %s2197_s16 = scalar_lea.hbm %s3744_s29, 256 }
 0x4af   : > { %p2194_p5 = scmp.ne.s32.totalorder %s3361_s18, %s2193_s21  ;;  %p2198_p9 = scmp.lt.s32.totalorder %s3361_s18, %s3744_s29 }
 0x4b0   : > { %p2199_p10 = scmp.lt.s32.totalorder %s2197_s16, %s2193_s21 }
 0x4b1   : > { %p2195_p6 = pnand %p2194_p5, %p2347_p4 }
 0x4b2   : > { %p2200_p11 = por %p2199_p10, %p2198_p9 }
 0x4b3   : > { %p2196_p7 = pneg %p2195_p6 }
 0x4b5   : > { %p2201_p12 = pnand %p2200_p11, %p2196_p7 }
 0x4b7   : > { %2204 = shalt.err (!%p2201_p12)
}
 0x4b8   : > { %2059 = dma.vmem_to_hbm [thread:$0]  (%p2347_p4), %s1651_s26, 128, %s3361_s18, %s1636_s20  }
 0x4b9 PF: > { %s3745_s25 = sld [smem:[#allocation15_spill]] }
 0x4ba   : > { %s3746_s7 = sld [smem:[#allocation10_spill]] }
 0x4bf   : > { %p2071_p13 = scmp.ge.s32.totalorder %s3745_s25, 2 }
 0x4c0   : > { %s1662_s17 = sand.u32 1, %s3746_s7  }
 0x4c1   : > { %p2066_p0 = pnand %p2071_p13, %p2354_p8  ;;  %s1663_s19 = scalar_lea.sflag [#allocation5], %s1662_s17 }
 0x4c3   : > { %p2067_p1 = pneg %p2066_p0 }
 0x4c5   : > { %2234 = dma.done.wait (%p2067_p1), %s1663_s19, 128  }
 0x4c6   : > { %2236 = vsyncadd (%p2067_p1), %s1663_s19, 4294967168  ;;  %s20_s26 = sadd.s32 1, %s3745_s25   ;;  %s3748_s21 = sld [smem:[#allocation11_spill]] }
 0x4c7   : > { %p17_p2 = scmp.ge.s32.totalorder %s20_s26, 4   ;;  %s3749_s22 = sld [smem:[#allocation12_spill]] }
 0x4c8   : > { %s3750_s23 = sld [smem:[#allocation19_spill]] }
 0x4c9   : > { %s3751_s24 = sld [smem:[#allocation14_spill]]  ;;  %19 = sbr.rel (!%p17_p2) target bundleno = 13 (0xd), region = 94 }
 0x4ca   : > { %s3752_s25 = sld [smem:[#allocation16_spill]] }
 0x4ce   :  { %1668 = vsyncpa [#allocation5], 1 }
 0x4cf   :  { %1670 = vsyncpa [#allocation5 + $0x1], 1 }
 0x4d0   :  { %1671 = vsyncpa [#allocation6], 1 }
 0x4d1   :  { %1673 = vsyncpa [#allocation6 + $0x1], 1 }

</bundles_post_ra>
